<compile_context>
chip_gen: v6e
topology: v6e:2x2x1
jax: 0.10.0
libtpu: 0.0.40
codegen_flags: <defaults>
</compile_context>

<pallas_src>
import jax
import jax.numpy as jnp
from jax import lax
from jax.experimental import pallas as pl
from jax.experimental.pallas import tpu as pltpu


def _round_up(x, m):
    return ((x + m - 1) // m) * m


def lstm_recurrence_kernel(preact_ref, whh_ref, wlin_ref, blin_ref, out_ref):
    """LSTM recurrence over T steps + linear head on the last hidden state.

    preact_ref: (T, B, 4*HP)  precomputed x_t @ W_ih + (b_ih + b_hh), gate-padded
                              gate order (i, f, g, o), each gate in a HP-lane block
    whh_ref:    (HP, 4*HP)    hidden->gate weights, zero-padded rows/columns
    wlin_ref:   (HP, O)       final linear weight (zero-padded rows)
    blin_ref:   (1, O)        final linear bias
    out_ref:    (B, O)        predictions
    """
    T, B, G = preact_ref.shape
    HP = G // 4

    # Hoist the weight load out of the recurrence (single vld, reused every step).
    whh = whh_ref[...]

    def sigmoid_t(x):
        # Exact identity: sigmoid(x) = 0.5 * (tanh(x / 2) + 1); keeps every
        # transcendental on the tanh EUP path (no exp + divide).
        return 0.5 * (jnp.tanh(0.5 * x) + 1.0)

    def step(t, carry):
        h, c = carry                                           # (B, HP) vregs
        # One wide MXU push per step: (B, HP) x (HP, 4*HP).
        pre = preact_ref[t] + jnp.dot(h, whh,
                                      preferred_element_type=jnp.float32)
        i_g = sigmoid_t(pre[:, 0 * HP:1 * HP])
        f_g = sigmoid_t(pre[:, 1 * HP:2 * HP])
        g_g = jnp.tanh(pre[:, 2 * HP:3 * HP])
        o_g = sigmoid_t(pre[:, 3 * HP:4 * HP])
        c_new = f_g * c + i_g * g_g
        h_new = o_g * jnp.tanh(c_new)
        return h_new, c_new

    h0 = jnp.zeros((B, HP), jnp.float32)
    c0 = jnp.zeros((B, HP), jnp.float32)
    # T is static; fully unroll so MXU latency hides under the VPU/EUP gate math.
    h, _ = lax.fori_loop(0, T, step, (h0, c0), unroll=True)

    # Linear head on the last hidden state (padded rows of wlin are zero).
    out_ref[...] = (jnp.dot(h, wlin_ref[...],
                            preferred_element_type=jnp.float32)
                    + blin_ref[...])


def lstm_model_forward(x_bti, w_ih, w_hh, bias, w_lin, b_lin):
    """Forward pass of LSTMModel.

    x_bti: (B, T, I)  batch_first input (PyTorch convention)
    w_ih:  (4, I, H)  input->gate weights, gate order (i, f, g, o)
    w_hh:  (4, H, H)  hidden->gate weights
    bias:  (4, H)     combined gate bias (b_ih + b_hh)
    w_lin: (H, O)     final linear weight (transposed from PyTorch (O, H))
    b_lin: (1, O)     final linear bias
    """
    B, T, I = x_bti.shape
    H = w_hh.shape[-1]
    O = w_lin.shape[-1]
    HP = _round_up(H, 128)   # pad each gate block to a 128-lane boundary

    # ---- weight packing into the lane-aligned wide layout (outside the kernel) ----
    w_ih_wide = jnp.zeros((I, 4 * HP), jnp.float32)
    w_hh_wide = jnp.zeros((HP, 4 * HP), jnp.float32)
    bias_wide = jnp.zeros((4 * HP,), jnp.float32)
    for k in range(4):
        w_ih_wide = w_ih_wide.at[:, k * HP:k * HP + H].set(w_ih[k])
        w_hh_wide = w_hh_wide.at[:H, k * HP:k * HP + H].set(w_hh[k])
        bias_wide = bias_wide.at[k * HP:k * HP + H].set(bias[k])
    w_lin_pad = jnp.zeros((HP, O), jnp.float32).at[:H, :].set(w_lin)

    # ---- input projection + bias hoisted out of the serial loop (one XLA matmul) ----
    x_tbi = jnp.transpose(x_bti, (1, 0, 2))                           # (T, B, I)
    preact = jnp.einsum('tbi,ig->tbg', x_tbi, w_ih_wide,
                        preferred_element_type=jnp.float32) + bias_wide  # (T, B, 4*HP)

    # TODO(synk): if B grows, add a 1-D grid over batch blocks
    #             (dimension_semantics=("parallel",)) so v7x's two TensorCores split it.
    kernel = pl.pallas_call(
        lstm_recurrence_kernel,
        out_shape=jax.ShapeDtypeStruct((B, O), jnp.float32),
        in_specs=[pl.BlockSpec(memory_space=pltpu.MemorySpace.VMEM)] * 4,
        out_specs=pl.BlockSpec(memory_space=pltpu.MemorySpace.VMEM),
        compiler_params=pltpu.CompilerParams(vmem_limit_bytes=32 << 20),
    )
    return kernel(preact, w_hh_wide, w_lin_pad, b_lin)


def lstm_model_reference(x_bti, w_ih, w_hh, bias, w_lin, b_lin):
    """Pure-JAX reference matching PyTorch nn.LSTM + Linear semantics."""
    B, T, I = x_bti.shape
    H = w_hh.shape[-1]
    h = jnp.zeros((B, H), jnp.float32)
    c = jnp.zeros((B, H), jnp.float32)
    for t in range(T):
        x_t = x_bti[:, t, :]
        gates = [x_t @ w_ih[k] + h @ w_hh[k] + bias[k] for k in range(4)]
        i_g = jax.nn.sigmoid(gates[0])
        f_g = jax.nn.sigmoid(gates[1])
        g_g = jnp.tanh(gates[2])
        o_g = jax.nn.sigmoid(gates[3])
        c = f_g * c + i_g * g_g
        h = o_g * jnp.tanh(c)
    return h @ w_lin + b_lin


if __name__ == "__main__":
    # Module hyperparameters (from LSTMModel.__init__ defaults)
    INPUT_SIZE = 1
    HIDDEN = 50
    OUTPUT_SIZE = 1
    BATCH = 2
    SEQ = 8

    key = jax.random.PRNGKey(0)
    k_x, k_wih, k_whh, k_bih, k_bhh, k_wl, k_bl = jax.random.split(key, 7)

    # PyTorch-style uniform(-1/sqrt(H), 1/sqrt(H)) init, deterministic.
    bound = 1.0 / jnp.sqrt(jnp.float32(HIDDEN))

    # Stacked gate weights in PyTorch gate order (i, f, g, o), pre-transposed
    # for right-multiplication: (4, I, H) and (4, H, H).
    w_ih = jax.random.uniform(k_wih, (4, INPUT_SIZE, HIDDEN), jnp.float32,
                              -bound, bound)
    w_hh = jax.random.uniform(k_whh, (4, HIDDEN, HIDDEN), jnp.float32,
                              -bound, bound)
    b_ih = jax.random.uniform(k_bih, (4, HIDDEN), jnp.float32, -bound, bound)
    b_hh = jax.random.uniform(k_bhh, (4, HIDDEN), jnp.float32, -bound, bound)
    bias = b_ih + b_hh                                   # (4, H)

    # Final linear: PyTorch weight is (O, H); store transposed (H, O).
    w_lin = jax.random.uniform(k_wl, (HIDDEN, OUTPUT_SIZE), jnp.float32,
                               -bound, bound)
    b_lin = jax.random.uniform(k_bl, (1, OUTPUT_SIZE), jnp.float32,
                               -bound, bound)

    # Input sequence, batch_first: (B, T, I)
    x = jax.random.normal(k_x, (BATCH, SEQ, INPUT_SIZE), jnp.float32)

    out = lstm_model_forward(x, w_ih, w_hh, bias, w_lin, b_lin)
    out = jax.block_until_ready(out)

    ref = lstm_model_reference(x, w_ih, w_hh, bias, w_lin, b_lin)
    assert out.shape == (BATCH, OUTPUT_SIZE)
    assert jnp.allclose(out, ref, atol=1e-5, rtol=1e-5), (out, ref)

    print("KERNEL_OK")
</pallas_src>

<mosaic_0001>
module attributes {stable_mosaic.version = 11 : i64} {
  func.func @lstm_recurrence_kernel(%arg0: memref<8x2x512xf32, #tpu.memory_space<vmem>>, %arg1: memref<128x512xf32, #tpu.memory_space<vmem>>, %arg2: memref<128x1xf32, #tpu.memory_space<vmem>>, %arg3: memref<1x1xf32, #tpu.memory_space<vmem>>, %arg4: memref<2x1xf32, #tpu.memory_space<vmem>>) attributes {dimension_semantics = [], scalar_prefetch = 0 : i64, scratch_operands = 0 : i64, tpu.core_type = #tpu.core_type<tc>} {
    %c0 = arith.constant 0 : index
    %c0_0 = arith.constant 0 : index
    %0 = vector.load %arg1[%c0, %c0_0] : memref<128x512xf32, #tpu.memory_space<vmem>>, vector<128x512xf32>
    %cst = arith.constant 0.000000e+00 : f32
    %1 = vector.broadcast %cst : f32 to vector<2x128xf32>
    %cst_1 = arith.constant 0.000000e+00 : f32
    %2 = vector.broadcast %cst_1 : f32 to vector<2x128xf32>
    %c0_i32 = arith.constant 0 : i32
    %3 = arith.index_cast %c0_i32 : i32 to index
    %c0_2 = arith.constant 0 : index
    %c0_3 = arith.constant 0 : index
    %4 = vector.load %arg0[%3, %c0_2, %c0_3] : memref<8x2x512xf32, #tpu.memory_space<vmem>>, vector<1x2x512xf32>
    %5 = vector.shape_cast %4 : vector<1x2x512xf32> to vector<2x512xf32>
    %cst_4 = arith.constant dense<0.000000e+00> : vector<2x512xf32>
    %6 = tpu.matmul %1, %0, %cst_4 {dimension_numbers = #tpu.dot_dimension_numbers<[1], [0], [0], [1], [0, 0, 1, 1], [], []>} : vector<2x128xf32>, vector<128x512xf32>, vector<2x512xf32> -> vector<2x512xf32>
    %7 = arith.addf %5, %6 : vector<2x512xf32>
    %8 = vector.extract_strided_slice %7 {offsets = [0, 0], sizes = [2, 128], strides = [1, 1]} : vector<2x512xf32> to vector<2x128xf32>
    %cst_5 = arith.constant 5.000000e-01 : f32
    %9 = vector.broadcast %cst_5 : f32 to vector<2x128xf32>
    %10 = arith.mulf %9, %8 : vector<2x128xf32>
    %11 = math.tanh %10 : vector<2x128xf32>
    %cst_6 = arith.constant 1.000000e+00 : f32
    %12 = vector.broadcast %cst_6 : f32 to vector<2x128xf32>
    %13 = arith.addf %11, %12 : vector<2x128xf32>
    %cst_7 = arith.constant 5.000000e-01 : f32
    %14 = vector.broadcast %cst_7 : f32 to vector<2x128xf32>
    %15 = arith.mulf %14, %13 : vector<2x128xf32>
    %16 = vector.extract_strided_slice %7 {offsets = [0, 128], sizes = [2, 128], strides = [1, 1]} : vector<2x512xf32> to vector<2x128xf32>
    %cst_8 = arith.constant 5.000000e-01 : f32
    %17 = vector.broadcast %cst_8 : f32 to vector<2x128xf32>
    %18 = arith.mulf %17, %16 : vector<2x128xf32>
    %19 = math.tanh %18 : vector<2x128xf32>
    %cst_9 = arith.constant 1.000000e+00 : f32
    %20 = vector.broadcast %cst_9 : f32 to vector<2x128xf32>
    %21 = arith.addf %19, %20 : vector<2x128xf32>
    %cst_10 = arith.constant 5.000000e-01 : f32
    %22 = vector.broadcast %cst_10 : f32 to vector<2x128xf32>
    %23 = arith.mulf %22, %21 : vector<2x128xf32>
    %24 = vector.extract_strided_slice %7 {offsets = [0, 256], sizes = [2, 128], strides = [1, 1]} : vector<2x512xf32> to vector<2x128xf32>
    %25 = math.tanh %24 : vector<2x128xf32>
    %26 = vector.extract_strided_slice %7 {offsets = [0, 384], sizes = [2, 128], strides = [1, 1]} : vector<2x512xf32> to vector<2x128xf32>
    %cst_11 = arith.constant 5.000000e-01 : f32
    %27 = vector.broadcast %cst_11 : f32 to vector<2x128xf32>
    %28 = arith.mulf %27, %26 : vector<2x128xf32>
    %29 = math.tanh %28 : vector<2x128xf32>
    %cst_12 = arith.constant 1.000000e+00 : f32
    %30 = vector.broadcast %cst_12 : f32 to vector<2x128xf32>
    %31 = arith.addf %29, %30 : vector<2x128xf32>
    %cst_13 = arith.constant 5.000000e-01 : f32
    %32 = vector.broadcast %cst_13 : f32 to vector<2x128xf32>
    %33 = arith.mulf %32, %31 : vector<2x128xf32>
    %34 = arith.mulf %23, %2 : vector<2x128xf32>
    %35 = arith.mulf %15, %25 : vector<2x128xf32>
    %36 = arith.addf %34, %35 : vector<2x128xf32>
    %37 = math.tanh %36 : vector<2x128xf32>
    %38 = arith.mulf %33, %37 : vector<2x128xf32>
    %c1_i32 = arith.constant 1 : i32
    %39 = arith.index_cast %c1_i32 : i32 to index
    %c0_14 = arith.constant 0 : index
    %c0_15 = arith.constant 0 : index
    %40 = vector.load %arg0[%39, %c0_14, %c0_15] : memref<8x2x512xf32, #tpu.memory_space<vmem>>, vector<1x2x512xf32>
    %41 = vector.shape_cast %40 : vector<1x2x512xf32> to vector<2x512xf32>
    %cst_16 = arith.constant dense<0.000000e+00> : vector<2x512xf32>
    %42 = tpu.matmul %38, %0, %cst_16 {dimension_numbers = #tpu.dot_dimension_numbers<[1], [0], [0], [1], [0, 0, 1, 1], [], []>} : vector<2x128xf32>, vector<128x512xf32>, vector<2x512xf32> -> vector<2x512xf32>
    %43 = arith.addf %41, %42 : vector<2x512xf32>
    %44 = vector.extract_strided_slice %43 {offsets = [0, 0], sizes = [2, 128], strides = [1, 1]} : vector<2x512xf32> to vector<2x128xf32>
    %cst_17 = arith.constant 5.000000e-01 : f32
    %45 = vector.broadcast %cst_17 : f32 to vector<2x128xf32>
    %46 = arith.mulf %45, %44 : vector<2x128xf32>
    %47 = math.tanh %46 : vector<2x128xf32>
    %cst_18 = arith.constant 1.000000e+00 : f32
    %48 = vector.broadcast %cst_18 : f32 to vector<2x128xf32>
    %49 = arith.addf %47, %48 : vector<2x128xf32>
    %cst_19 = arith.constant 5.000000e-01 : f32
    %50 = vector.broadcast %cst_19 : f32 to vector<2x128xf32>
    %51 = arith.mulf %50, %49 : vector<2x128xf32>
    %52 = vector.extract_strided_slice %43 {offsets = [0, 128], sizes = [2, 128], strides = [1, 1]} : vector<2x512xf32> to vector<2x128xf32>
    %cst_20 = arith.constant 5.000000e-01 : f32
    %53 = vector.broadcast %cst_20 : f32 to vector<2x128xf32>
    %54 = arith.mulf %53, %52 : vector<2x128xf32>
    %55 = math.tanh %54 : vector<2x128xf32>
    %cst_21 = arith.constant 1.000000e+00 : f32
    %56 = vector.broadcast %cst_21 : f32 to vector<2x128xf32>
    %57 = arith.addf %55, %56 : vector<2x128xf32>
    %cst_22 = arith.constant 5.000000e-01 : f32
    %58 = vector.broadcast %cst_22 : f32 to vector<2x128xf32>
    %59 = arith.mulf %58, %57 : vector<2x128xf32>
    %60 = vector.extract_strided_slice %43 {offsets = [0, 256], sizes = [2, 128], strides = [1, 1]} : vector<2x512xf32> to vector<2x128xf32>
    %61 = math.tanh %60 : vector<2x128xf32>
    %62 = vector.extract_strided_slice %43 {offsets = [0, 384], sizes = [2, 128], strides = [1, 1]} : vector<2x512xf32> to vector<2x128xf32>
    %cst_23 = arith.constant 5.000000e-01 : f32
    %63 = vector.broadcast %cst_23 : f32 to vector<2x128xf32>
    %64 = arith.mulf %63, %62 : vector<2x128xf32>
    %65 = math.tanh %64 : vector<2x128xf32>
    %cst_24 = arith.constant 1.000000e+00 : f32
    %66 = vector.broadcast %cst_24 : f32 to vector<2x128xf32>
    %67 = arith.addf %65, %66 : vector<2x128xf32>
    %cst_25 = arith.constant 5.000000e-01 : f32
    %68 = vector.broadcast %cst_25 : f32 to vector<2x128xf32>
    %69 = arith.mulf %68, %67 : vector<2x128xf32>
    %70 = arith.mulf %59, %36 : vector<2x128xf32>
    %71 = arith.mulf %51, %61 : vector<2x128xf32>
    %72 = arith.addf %70, %71 : vector<2x128xf32>
    %73 = math.tanh %72 : vector<2x128xf32>
    %74 = arith.mulf %69, %73 : vector<2x128xf32>
    %c2_i32 = arith.constant 2 : i32
    %75 = arith.index_cast %c2_i32 : i32 to index
    %c0_26 = arith.constant 0 : index
    %c0_27 = arith.constant 0 : index
    %76 = vector.load %arg0[%75, %c0_26, %c0_27] : memref<8x2x512xf32, #tpu.memory_space<vmem>>, vector<1x2x512xf32>
    %77 = vector.shape_cast %76 : vector<1x2x512xf32> to vector<2x512xf32>
    %cst_28 = arith.constant dense<0.000000e+00> : vector<2x512xf32>
    %78 = tpu.matmul %74, %0, %cst_28 {dimension_numbers = #tpu.dot_dimension_numbers<[1], [0], [0], [1], [0, 0, 1, 1], [], []>} : vector<2x128xf32>, vector<128x512xf32>, vector<2x512xf32> -> vector<2x512xf32>
    %79 = arith.addf %77, %78 : vector<2x512xf32>
    %80 = vector.extract_strided_slice %79 {offsets = [0, 0], sizes = [2, 128], strides = [1, 1]} : vector<2x512xf32> to vector<2x128xf32>
    %cst_29 = arith.constant 5.000000e-01 : f32
    %81 = vector.broadcast %cst_29 : f32 to vector<2x128xf32>
    %82 = arith.mulf %81, %80 : vector<2x128xf32>
    %83 = math.tanh %82 : vector<2x128xf32>
    %cst_30 = arith.constant 1.000000e+00 : f32
    %84 = vector.broadcast %cst_30 : f32 to vector<2x128xf32>
    %85 = arith.addf %83, %84 : vector<2x128xf32>
    %cst_31 = arith.constant 5.000000e-01 : f32
    %86 = vector.broadcast %cst_31 : f32 to vector<2x128xf32>
    %87 = arith.mulf %86, %85 : vector<2x128xf32>
    %88 = vector.extract_strided_slice %79 {offsets = [0, 128], sizes = [2, 128], strides = [1, 1]} : vector<2x512xf32> to vector<2x128xf32>
    %cst_32 = arith.constant 5.000000e-01 : f32
    %89 = vector.broadcast %cst_32 : f32 to vector<2x128xf32>
    %90 = arith.mulf %89, %88 : vector<2x128xf32>
    %91 = math.tanh %90 : vector<2x128xf32>
    %cst_33 = arith.constant 1.000000e+00 : f32
    %92 = vector.broadcast %cst_33 : f32 to vector<2x128xf32>
    %93 = arith.addf %91, %92 : vector<2x128xf32>
    %cst_34 = arith.constant 5.000000e-01 : f32
    %94 = vector.broadcast %cst_34 : f32 to vector<2x128xf32>
    %95 = arith.mulf %94, %93 : vector<2x128xf32>
    %96 = vector.extract_strided_slice %79 {offsets = [0, 256], sizes = [2, 128], strides = [1, 1]} : vector<2x512xf32> to vector<2x128xf32>
    %97 = math.tanh %96 : vector<2x128xf32>
    %98 = vector.extract_strided_slice %79 {offsets = [0, 384], sizes = [2, 128], strides = [1, 1]} : vector<2x512xf32> to vector<2x128xf32>
    %cst_35 = arith.constant 5.000000e-01 : f32
    %99 = vector.broadcast %cst_35 : f32 to vector<2x128xf32>
    %100 = arith.mulf %99, %98 : vector<2x128xf32>
    %101 = math.tanh %100 : vector<2x128xf32>
    %cst_36 = arith.constant 1.000000e+00 : f32
    %102 = vector.broadcast %cst_36 : f32 to vector<2x128xf32>
    %103 = arith.addf %101, %102 : vector<2x128xf32>
    %cst_37 = arith.constant 5.000000e-01 : f32
    %104 = vector.broadcast %cst_37 : f32 to vector<2x128xf32>
    %105 = arith.mulf %104, %103 : vector<2x128xf32>
    %106 = arith.mulf %95, %72 : vector<2x128xf32>
    %107 = arith.mulf %87, %97 : vector<2x128xf32>
    %108 = arith.addf %106, %107 : vector<2x128xf32>
    %109 = math.tanh %108 : vector<2x128xf32>
    %110 = arith.mulf %105, %109 : vector<2x128xf32>
    %c3_i32 = arith.constant 3 : i32
    %111 = arith.index_cast %c3_i32 : i32 to index
    %c0_38 = arith.constant 0 : index
    %c0_39 = arith.constant 0 : index
    %112 = vector.load %arg0[%111, %c0_38, %c0_39] : memref<8x2x512xf32, #tpu.memory_space<vmem>>, vector<1x2x512xf32>
    %113 = vector.shape_cast %112 : vector<1x2x512xf32> to vector<2x512xf32>
    %cst_40 = arith.constant dense<0.000000e+00> : vector<2x512xf32>
    %114 = tpu.matmul %110, %0, %cst_40 {dimension_numbers = #tpu.dot_dimension_numbers<[1], [0], [0], [1], [0, 0, 1, 1], [], []>} : vector<2x128xf32>, vector<128x512xf32>, vector<2x512xf32> -> vector<2x512xf32>
    %115 = arith.addf %113, %114 : vector<2x512xf32>
    %116 = vector.extract_strided_slice %115 {offsets = [0, 0], sizes = [2, 128], strides = [1, 1]} : vector<2x512xf32> to vector<2x128xf32>
    %cst_41 = arith.constant 5.000000e-01 : f32
    %117 = vector.broadcast %cst_41 : f32 to vector<2x128xf32>
    %118 = arith.mulf %117, %116 : vector<2x128xf32>
    %119 = math.tanh %118 : vector<2x128xf32>
    %cst_42 = arith.constant 1.000000e+00 : f32
    %120 = vector.broadcast %cst_42 : f32 to vector<2x128xf32>
    %121 = arith.addf %119, %120 : vector<2x128xf32>
    %cst_43 = arith.constant 5.000000e-01 : f32
    %122 = vector.broadcast %cst_43 : f32 to vector<2x128xf32>
    %123 = arith.mulf %122, %121 : vector<2x128xf32>
    %124 = vector.extract_strided_slice %115 {offsets = [0, 128], sizes = [2, 128], strides = [1, 1]} : vector<2x512xf32> to vector<2x128xf32>
    %cst_44 = arith.constant 5.000000e-01 : f32
    %125 = vector.broadcast %cst_44 : f32 to vector<2x128xf32>
    %126 = arith.mulf %125, %124 : vector<2x128xf32>
    %127 = math.tanh %126 : vector<2x128xf32>
    %cst_45 = arith.constant 1.000000e+00 : f32
    %128 = vector.broadcast %cst_45 : f32 to vector<2x128xf32>
    %129 = arith.addf %127, %128 : vector<2x128xf32>
    %cst_46 = arith.constant 5.000000e-01 : f32
    %130 = vector.broadcast %cst_46 : f32 to vector<2x128xf32>
    %131 = arith.mulf %130, %129 : vector<2x128xf32>
    %132 = vector.extract_strided_slice %115 {offsets = [0, 256], sizes = [2, 128], strides = [1, 1]} : vector<2x512xf32> to vector<2x128xf32>
    %133 = math.tanh %132 : vector<2x128xf32>
    %134 = vector.extract_strided_slice %115 {offsets = [0, 384], sizes = [2, 128], strides = [1, 1]} : vector<2x512xf32> to vector<2x128xf32>
    %cst_47 = arith.constant 5.000000e-01 : f32
    %135 = vector.broadcast %cst_47 : f32 to vector<2x128xf32>
    %136 = arith.mulf %135, %134 : vector<2x128xf32>
    %137 = math.tanh %136 : vector<2x128xf32>
    %cst_48 = arith.constant 1.000000e+00 : f32
    %138 = vector.broadcast %cst_48 : f32 to vector<2x128xf32>
    %139 = arith.addf %137, %138 : vector<2x128xf32>
    %cst_49 = arith.constant 5.000000e-01 : f32
    %140 = vector.broadcast %cst_49 : f32 to vector<2x128xf32>
    %141 = arith.mulf %140, %139 : vector<2x128xf32>
    %142 = arith.mulf %131, %108 : vector<2x128xf32>
    %143 = arith.mulf %123, %133 : vector<2x128xf32>
    %144 = arith.addf %142, %143 : vector<2x128xf32>
    %145 = math.tanh %144 : vector<2x128xf32>
    %146 = arith.mulf %141, %145 : vector<2x128xf32>
    %c4_i32 = arith.constant 4 : i32
    %147 = arith.index_cast %c4_i32 : i32 to index
    %c0_50 = arith.constant 0 : index
    %c0_51 = arith.constant 0 : index
    %148 = vector.load %arg0[%147, %c0_50, %c0_51] : memref<8x2x512xf32, #tpu.memory_space<vmem>>, vector<1x2x512xf32>
    %149 = vector.shape_cast %148 : vector<1x2x512xf32> to vector<2x512xf32>
    %cst_52 = arith.constant dense<0.000000e+00> : vector<2x512xf32>
    %150 = tpu.matmul %146, %0, %cst_52 {dimension_numbers = #tpu.dot_dimension_numbers<[1], [0], [0], [1], [0, 0, 1, 1], [], []>} : vector<2x128xf32>, vector<128x512xf32>, vector<2x512xf32> -> vector<2x512xf32>
    %151 = arith.addf %149, %150 : vector<2x512xf32>
    %152 = vector.extract_strided_slice %151 {offsets = [0, 0], sizes = [2, 128], strides = [1, 1]} : vector<2x512xf32> to vector<2x128xf32>
    %cst_53 = arith.constant 5.000000e-01 : f32
    %153 = vector.broadcast %cst_53 : f32 to vector<2x128xf32>
    %154 = arith.mulf %153, %152 : vector<2x128xf32>
    %155 = math.tanh %154 : vector<2x128xf32>
    %cst_54 = arith.constant 1.000000e+00 : f32
    %156 = vector.broadcast %cst_54 : f32 to vector<2x128xf32>
    %157 = arith.addf %155, %156 : vector<2x128xf32>
    %cst_55 = arith.constant 5.000000e-01 : f32
    %158 = vector.broadcast %cst_55 : f32 to vector<2x128xf32>
    %159 = arith.mulf %158, %157 : vector<2x128xf32>
    %160 = vector.extract_strided_slice %151 {offsets = [0, 128], sizes = [2, 128], strides = [1, 1]} : vector<2x512xf32> to vector<2x128xf32>
    %cst_56 = arith.constant 5.000000e-01 : f32
    %161 = vector.broadcast %cst_56 : f32 to vector<2x128xf32>
    %162 = arith.mulf %161, %160 : vector<2x128xf32>
    %163 = math.tanh %162 : vector<2x128xf32>
    %cst_57 = arith.constant 1.000000e+00 : f32
    %164 = vector.broadcast %cst_57 : f32 to vector<2x128xf32>
    %165 = arith.addf %163, %164 : vector<2x128xf32>
    %cst_58 = arith.constant 5.000000e-01 : f32
    %166 = vector.broadcast %cst_58 : f32 to vector<2x128xf32>
    %167 = arith.mulf %166, %165 : vector<2x128xf32>
    %168 = vector.extract_strided_slice %151 {offsets = [0, 256], sizes = [2, 128], strides = [1, 1]} : vector<2x512xf32> to vector<2x128xf32>
    %169 = math.tanh %168 : vector<2x128xf32>
    %170 = vector.extract_strided_slice %151 {offsets = [0, 384], sizes = [2, 128], strides = [1, 1]} : vector<2x512xf32> to vector<2x128xf32>
    %cst_59 = arith.constant 5.000000e-01 : f32
    %171 = vector.broadcast %cst_59 : f32 to vector<2x128xf32>
    %172 = arith.mulf %171, %170 : vector<2x128xf32>
    %173 = math.tanh %172 : vector<2x128xf32>
    %cst_60 = arith.constant 1.000000e+00 : f32
    %174 = vector.broadcast %cst_60 : f32 to vector<2x128xf32>
    %175 = arith.addf %173, %174 : vector<2x128xf32>
    %cst_61 = arith.constant 5.000000e-01 : f32
    %176 = vector.broadcast %cst_61 : f32 to vector<2x128xf32>
    %177 = arith.mulf %176, %175 : vector<2x128xf32>
    %178 = arith.mulf %167, %144 : vector<2x128xf32>
    %179 = arith.mulf %159, %169 : vector<2x128xf32>
    %180 = arith.addf %178, %179 : vector<2x128xf32>
    %181 = math.tanh %180 : vector<2x128xf32>
    %182 = arith.mulf %177, %181 : vector<2x128xf32>
    %c5_i32 = arith.constant 5 : i32
    %183 = arith.index_cast %c5_i32 : i32 to index
    %c0_62 = arith.constant 0 : index
    %c0_63 = arith.constant 0 : index
    %184 = vector.load %arg0[%183, %c0_62, %c0_63] : memref<8x2x512xf32, #tpu.memory_space<vmem>>, vector<1x2x512xf32>
    %185 = vector.shape_cast %184 : vector<1x2x512xf32> to vector<2x512xf32>
    %cst_64 = arith.constant dense<0.000000e+00> : vector<2x512xf32>
    %186 = tpu.matmul %182, %0, %cst_64 {dimension_numbers = #tpu.dot_dimension_numbers<[1], [0], [0], [1], [0, 0, 1, 1], [], []>} : vector<2x128xf32>, vector<128x512xf32>, vector<2x512xf32> -> vector<2x512xf32>
    %187 = arith.addf %185, %186 : vector<2x512xf32>
    %188 = vector.extract_strided_slice %187 {offsets = [0, 0], sizes = [2, 128], strides = [1, 1]} : vector<2x512xf32> to vector<2x128xf32>
    %cst_65 = arith.constant 5.000000e-01 : f32
    %189 = vector.broadcast %cst_65 : f32 to vector<2x128xf32>
    %190 = arith.mulf %189, %188 : vector<2x128xf32>
    %191 = math.tanh %190 : vector<2x128xf32>
    %cst_66 = arith.constant 1.000000e+00 : f32
    %192 = vector.broadcast %cst_66 : f32 to vector<2x128xf32>
    %193 = arith.addf %191, %192 : vector<2x128xf32>
    %cst_67 = arith.constant 5.000000e-01 : f32
    %194 = vector.broadcast %cst_67 : f32 to vector<2x128xf32>
    %195 = arith.mulf %194, %193 : vector<2x128xf32>
    %196 = vector.extract_strided_slice %187 {offsets = [0, 128], sizes = [2, 128], strides = [1, 1]} : vector<2x512xf32> to vector<2x128xf32>
    %cst_68 = arith.constant 5.000000e-01 : f32
    %197 = vector.broadcast %cst_68 : f32 to vector<2x128xf32>
    %198 = arith.mulf %197, %196 : vector<2x128xf32>
    %199 = math.tanh %198 : vector<2x128xf32>
    %cst_69 = arith.constant 1.000000e+00 : f32
    %200 = vector.broadcast %cst_69 : f32 to vector<2x128xf32>
    %201 = arith.addf %199, %200 : vector<2x128xf32>
    %cst_70 = arith.constant 5.000000e-01 : f32
    %202 = vector.broadcast %cst_70 : f32 to vector<2x128xf32>
    %203 = arith.mulf %202, %201 : vector<2x128xf32>
    %204 = vector.extract_strided_slice %187 {offsets = [0, 256], sizes = [2, 128], strides = [1, 1]} : vector<2x512xf32> to vector<2x128xf32>
    %205 = math.tanh %204 : vector<2x128xf32>
    %206 = vector.extract_strided_slice %187 {offsets = [0, 384], sizes = [2, 128], strides = [1, 1]} : vector<2x512xf32> to vector<2x128xf32>
    %cst_71 = arith.constant 5.000000e-01 : f32
    %207 = vector.broadcast %cst_71 : f32 to vector<2x128xf32>
    %208 = arith.mulf %207, %206 : vector<2x128xf32>
    %209 = math.tanh %208 : vector<2x128xf32>
    %cst_72 = arith.constant 1.000000e+00 : f32
    %210 = vector.broadcast %cst_72 : f32 to vector<2x128xf32>
    %211 = arith.addf %209, %210 : vector<2x128xf32>
    %cst_73 = arith.constant 5.000000e-01 : f32
    %212 = vector.broadcast %cst_73 : f32 to vector<2x128xf32>
    %213 = arith.mulf %212, %211 : vector<2x128xf32>
    %214 = arith.mulf %203, %180 : vector<2x128xf32>
    %215 = arith.mulf %195, %205 : vector<2x128xf32>
    %216 = arith.addf %214, %215 : vector<2x128xf32>
    %217 = math.tanh %216 : vector<2x128xf32>
    %218 = arith.mulf %213, %217 : vector<2x128xf32>
    %c6_i32 = arith.constant 6 : i32
    %219 = arith.index_cast %c6_i32 : i32 to index
    %c0_74 = arith.constant 0 : index
    %c0_75 = arith.constant 0 : index
    %220 = vector.load %arg0[%219, %c0_74, %c0_75] : memref<8x2x512xf32, #tpu.memory_space<vmem>>, vector<1x2x512xf32>
    %221 = vector.shape_cast %220 : vector<1x2x512xf32> to vector<2x512xf32>
    %cst_76 = arith.constant dense<0.000000e+00> : vector<2x512xf32>
    %222 = tpu.matmul %218, %0, %cst_76 {dimension_numbers = #tpu.dot_dimension_numbers<[1], [0], [0], [1], [0, 0, 1, 1], [], []>} : vector<2x128xf32>, vector<128x512xf32>, vector<2x512xf32> -> vector<2x512xf32>
    %223 = arith.addf %221, %222 : vector<2x512xf32>
    %224 = vector.extract_strided_slice %223 {offsets = [0, 0], sizes = [2, 128], strides = [1, 1]} : vector<2x512xf32> to vector<2x128xf32>
    %cst_77 = arith.constant 5.000000e-01 : f32
    %225 = vector.broadcast %cst_77 : f32 to vector<2x128xf32>
    %226 = arith.mulf %225, %224 : vector<2x128xf32>
    %227 = math.tanh %226 : vector<2x128xf32>
    %cst_78 = arith.constant 1.000000e+00 : f32
    %228 = vector.broadcast %cst_78 : f32 to vector<2x128xf32>
    %229 = arith.addf %227, %228 : vector<2x128xf32>
    %cst_79 = arith.constant 5.000000e-01 : f32
    %230 = vector.broadcast %cst_79 : f32 to vector<2x128xf32>
    %231 = arith.mulf %230, %229 : vector<2x128xf32>
    %232 = vector.extract_strided_slice %223 {offsets = [0, 128], sizes = [2, 128], strides = [1, 1]} : vector<2x512xf32> to vector<2x128xf32>
    %cst_80 = arith.constant 5.000000e-01 : f32
    %233 = vector.broadcast %cst_80 : f32 to vector<2x128xf32>
    %234 = arith.mulf %233, %232 : vector<2x128xf32>
    %235 = math.tanh %234 : vector<2x128xf32>
    %cst_81 = arith.constant 1.000000e+00 : f32
    %236 = vector.broadcast %cst_81 : f32 to vector<2x128xf32>
    %237 = arith.addf %235, %236 : vector<2x128xf32>
    %cst_82 = arith.constant 5.000000e-01 : f32
    %238 = vector.broadcast %cst_82 : f32 to vector<2x128xf32>
    %239 = arith.mulf %238, %237 : vector<2x128xf32>
    %240 = vector.extract_strided_slice %223 {offsets = [0, 256], sizes = [2, 128], strides = [1, 1]} : vector<2x512xf32> to vector<2x128xf32>
    %241 = math.tanh %240 : vector<2x128xf32>
    %242 = vector.extract_strided_slice %223 {offsets = [0, 384], sizes = [2, 128], strides = [1, 1]} : vector<2x512xf32> to vector<2x128xf32>
    %cst_83 = arith.constant 5.000000e-01 : f32
    %243 = vector.broadcast %cst_83 : f32 to vector<2x128xf32>
    %244 = arith.mulf %243, %242 : vector<2x128xf32>
    %245 = math.tanh %244 : vector<2x128xf32>
    %cst_84 = arith.constant 1.000000e+00 : f32
    %246 = vector.broadcast %cst_84 : f32 to vector<2x128xf32>
    %247 = arith.addf %245, %246 : vector<2x128xf32>
    %cst_85 = arith.constant 5.000000e-01 : f32
    %248 = vector.broadcast %cst_85 : f32 to vector<2x128xf32>
    %249 = arith.mulf %248, %247 : vector<2x128xf32>
    %250 = arith.mulf %239, %216 : vector<2x128xf32>
    %251 = arith.mulf %231, %241 : vector<2x128xf32>
    %252 = arith.addf %250, %251 : vector<2x128xf32>
    %253 = math.tanh %252 : vector<2x128xf32>
    %254 = arith.mulf %249, %253 : vector<2x128xf32>
    %c7_i32 = arith.constant 7 : i32
    %255 = arith.index_cast %c7_i32 : i32 to index
    %c0_86 = arith.constant 0 : index
    %c0_87 = arith.constant 0 : index
    %256 = vector.load %arg0[%255, %c0_86, %c0_87] : memref<8x2x512xf32, #tpu.memory_space<vmem>>, vector<1x2x512xf32>
    %257 = vector.shape_cast %256 : vector<1x2x512xf32> to vector<2x512xf32>
    %cst_88 = arith.constant dense<0.000000e+00> : vector<2x512xf32>
    %258 = tpu.matmul %254, %0, %cst_88 {dimension_numbers = #tpu.dot_dimension_numbers<[1], [0], [0], [1], [0, 0, 1, 1], [], []>} : vector<2x128xf32>, vector<128x512xf32>, vector<2x512xf32> -> vector<2x512xf32>
    %259 = arith.addf %257, %258 : vector<2x512xf32>
    %260 = vector.extract_strided_slice %259 {offsets = [0, 0], sizes = [2, 128], strides = [1, 1]} : vector<2x512xf32> to vector<2x128xf32>
    %cst_89 = arith.constant 5.000000e-01 : f32
    %261 = vector.broadcast %cst_89 : f32 to vector<2x128xf32>
    %262 = arith.mulf %261, %260 : vector<2x128xf32>
    %263 = math.tanh %262 : vector<2x128xf32>
    %cst_90 = arith.constant 1.000000e+00 : f32
    %264 = vector.broadcast %cst_90 : f32 to vector<2x128xf32>
    %265 = arith.addf %263, %264 : vector<2x128xf32>
    %cst_91 = arith.constant 5.000000e-01 : f32
    %266 = vector.broadcast %cst_91 : f32 to vector<2x128xf32>
    %267 = arith.mulf %266, %265 : vector<2x128xf32>
    %268 = vector.extract_strided_slice %259 {offsets = [0, 128], sizes = [2, 128], strides = [1, 1]} : vector<2x512xf32> to vector<2x128xf32>
    %cst_92 = arith.constant 5.000000e-01 : f32
    %269 = vector.broadcast %cst_92 : f32 to vector<2x128xf32>
    %270 = arith.mulf %269, %268 : vector<2x128xf32>
    %271 = math.tanh %270 : vector<2x128xf32>
    %cst_93 = arith.constant 1.000000e+00 : f32
    %272 = vector.broadcast %cst_93 : f32 to vector<2x128xf32>
    %273 = arith.addf %271, %272 : vector<2x128xf32>
    %cst_94 = arith.constant 5.000000e-01 : f32
    %274 = vector.broadcast %cst_94 : f32 to vector<2x128xf32>
    %275 = arith.mulf %274, %273 : vector<2x128xf32>
    %276 = vector.extract_strided_slice %259 {offsets = [0, 256], sizes = [2, 128], strides = [1, 1]} : vector<2x512xf32> to vector<2x128xf32>
    %277 = math.tanh %276 : vector<2x128xf32>
    %278 = vector.extract_strided_slice %259 {offsets = [0, 384], sizes = [2, 128], strides = [1, 1]} : vector<2x512xf32> to vector<2x128xf32>
    %cst_95 = arith.constant 5.000000e-01 : f32
    %279 = vector.broadcast %cst_95 : f32 to vector<2x128xf32>
    %280 = arith.mulf %279, %278 : vector<2x128xf32>
    %281 = math.tanh %280 : vector<2x128xf32>
    %cst_96 = arith.constant 1.000000e+00 : f32
    %282 = vector.broadcast %cst_96 : f32 to vector<2x128xf32>
    %283 = arith.addf %281, %282 : vector<2x128xf32>
    %cst_97 = arith.constant 5.000000e-01 : f32
    %284 = vector.broadcast %cst_97 : f32 to vector<2x128xf32>
    %285 = arith.mulf %284, %283 : vector<2x128xf32>
    %286 = arith.mulf %275, %252 : vector<2x128xf32>
    %287 = arith.mulf %267, %277 : vector<2x128xf32>
    %288 = arith.addf %286, %287 : vector<2x128xf32>
    %289 = math.tanh %288 : vector<2x128xf32>
    %290 = arith.mulf %285, %289 : vector<2x128xf32>
    %c8_i32 = arith.constant 8 : i32
    %c0_98 = arith.constant 0 : index
    %c0_99 = arith.constant 0 : index
    %291 = vector.load %arg2[%c0_98, %c0_99] : memref<128x1xf32, #tpu.memory_space<vmem>>, vector<128x1xf32>
    %cst_100 = arith.constant dense<0.000000e+00> : vector<2x1xf32>
    %292 = tpu.matmul %290, %291, %cst_100 {dimension_numbers = #tpu.dot_dimension_numbers<[1], [0], [0], [1], [0, 0, 1, 1], [], []>} : vector<2x128xf32>, vector<128x1xf32>, vector<2x1xf32> -> vector<2x1xf32>
    %c0_101 = arith.constant 0 : index
    %c0_102 = arith.constant 0 : index
    %293 = vector.load %arg3[%c0_101, %c0_102] : memref<1x1xf32, #tpu.memory_space<vmem>>, vector<1x1xf32>
    %294 = vector.broadcast %293 : vector<1x1xf32> to vector<2x1xf32>
    %295 = arith.addf %292, %294 : vector<2x1xf32>
    %c0_103 = arith.constant 0 : index
    %c0_104 = arith.constant 0 : index
    %296 = vector.load %arg4[%c0_103, %c0_104] : memref<2x1xf32, #tpu.memory_space<vmem>>, vector<2x1xf32>
    tpu.vector_store %arg4[%c0_103, %c0_104], %295 {strides = array<i32>} : memref<2x1xf32, #tpu.memory_space<vmem>>, vector<2x1xf32>,
    return
  }
}

</mosaic_0001>

<bundles_post_ra>
// kernel: tpu_custom_call.1
= control target key start
LH: loop header
LB: loop body
LE: loop exit
PB: predicated region body
PF: predicated region fallthrough
CT: control target
= control target key end

     0   :  { %s2925_s0 = inlined_call_operand.vmem [shape: f32[8,2,512], index: 0, kind: input, shape index: {}]   ;;  %s2926_s1 = inlined_call_operand.hbm [shape: f32[128,512], index: 1, kind: input, shape index: {}]   ;;  %s2927_s2 = inlined_call_operand.vmem [shape: f32[128,1], index: 2, kind: input, shape index: {}]   ;;  %s2928_s3 = inlined_call_operand.<no memory space> [shape: f32[1,1], index: 3, kind: input, shape index: {}]   ;;  %s2929_s4 = inlined_call_operand.vmem [shape: f32[2,1], index: 4, kind: output, shape index: {}]  }
   0x1   :  { %v9_v0 = vstv %s2928_s3 }
   0x2   :  { %10 = vst [vmem:[#allocation2] sm:$0x1] %v9_v0 }
   0x3   :  { %11 = vsyncpa [#allocation4], 0  ;;  %s1964_s17 = smov [#allocation3]  }
   0x4   :  { %s19_s18 = sshll.u32 %s1964_s17, 4  ;;  %s20_s18 = int_to_ptr.vmem [resolvable:$true] %s19_s18 }
   0x5   :  { %s1950_s19 = scalar_lea.vmem %s20_s18, 8192  ;;  %p1955_p1 = scmp.lt.s32.totalorder %s20_s18, %s20_s18 }
   0x6   :  { %p1951_p0 = scmp.ne.s32.totalorder %s20_s18, %s1950_s19  ;;  %p1956_p2 = scmp.lt.s32.totalorder %s1950_s19, %s1950_s19 }
   0x8   :  { %p1957_p3 = por %p1956_p2, %p1955_p1 }
   0xa   :  { %p1958_p4 = pnand %p1957_p3, %p1951_p0 }
   0xc   :  { %1961 = shalt.err (!%p1958_p4)
}
   0xd   :  { %s1965_s20 = smov 512   ;;  %s1966_s21 = smov 32  }
   0xe   :  { %25 = dma.hbm_to_vmem [thread:$0]  %s2926_s1, 8192, %s20_s18, [#allocation4], %s1965_s20, %s1965_s20, %s1966_s21  }
   0xf   :  { %1962 = dma.done.wait [#allocation4], 8192  }
  0x10   :  { %1963 = vsyncadd [#allocation4], 4294959104  ;;  %v2930_v1 = vmov 0.0   ;;  %v2003_v2 = vld [vmem:[#allocation3 + $0x1e8] sm:$0xff]  ;;  %v2005_v3 = vld [vmem:[#allocation3 + $0x1f8] sm:$0xff]  ;;  %vm1969_vm0 = vmmov 0  }
  0x11   :  { %162 = vmatprep.mubr.f32.mxu0 %v2930_v1  ;;  %233 = vmatprep.mubr.f32.mxu1 %v2930_v1  ;;  %3008 = vst [vmem:[#allocation6_spill] sm:$0xff] %v2003_v2  ;;  %3009 = vst [vmem:[#allocation7_spill] sm:$0xff] %v2005_v3  ;;  %v2007_v4 = vld [vmem:[#allocation3 + $0x1e0] sm:$0xff]  ;;  %v2011_v5 = vld [vmem:[#allocation3 + $0x1f0] sm:$0xff]  ;;  %vm1725_vm1 = vcmask 1024  }
  0x12   :  { %98 = vmatprep.subr.mxu0 %v2003_v2  ;;  %169 = vmatprep.subr.mxu1 %v2005_v3  ;;  %v2013_v6 = vld [vmem:[#allocation3 + $0x1c8] sm:$0xff]  ;;  %v2015_v7 = vld [vmem:[#allocation3 + $0x1d8] sm:$0xff]  ;;  %v2019_v8 = vld [vmem:[#allocation3 + $0x1c0] sm:$0xff] }
  0x13   :  { %99 = vmatpush1.msra.mxu0 %v2007_v4  ;;  %170 = vmatpush1.msra.mxu1 %v2011_v5  ;;  %v2021_v9 = vld [vmem:[#allocation3 + $0x1d0] sm:$0xff]  ;;  %v2023_v10 = vld [vmem:[#allocation3 + $0x1a8] sm:$0xff]  ;;  %v2027_v11 = vld [vmem:[#allocation3 + $0x1b8] sm:$0xff] }
  0x14   :  { %100 = vmatprep.subr.mxu0 %v2013_v6  ;;  %171 = vmatprep.subr.mxu1 %v2015_v7  ;;  %v2029_v12 = vld [vmem:[#allocation3 + $0x1a0] sm:$0xff]  ;;  %v2031_v13 = vld [vmem:[#allocation3 + $0x1b0] sm:$0xff]  ;;  %v2035_v14 = vld [vmem:[#allocation3 + $0x188] sm:$0xff] }
  0x15   :  { %101 = vmatpush1.msra.mxu0 %v2019_v8  ;;  %172 = vmatpush1.msra.mxu1 %v2021_v9  ;;  %v2037_v15 = vld [vmem:[#allocation3 + $0x198] sm:$0xff]  ;;  %v2041_v16 = vld [vmem:[#allocation3 + $0x180] sm:$0xff]  ;;  %v2043_v17 = vld [vmem:[#allocation3 + $0x190] sm:$0xff] }
  0x16   :  { %102 = vmatprep.subr.mxu0 %v2023_v10  ;;  %173 = vmatprep.subr.mxu1 %v2027_v11  ;;  %v2047_v18 = vld [vmem:[#allocation3 + $0x168] sm:$0xff]  ;;  %v2049_v19 = vld [vmem:[#allocation3 + $0x178] sm:$0xff]  ;;  %v2053_v20 = vld [vmem:[#allocation3 + $0x160] sm:$0xff] }
  0x17   :  { %103 = vmatpush1.msra.mxu0 %v2029_v12  ;;  %174 = vmatpush1.msra.mxu1 %v2031_v13  ;;  %v2055_v21 = vld [vmem:[#allocation3 + $0x170] sm:$0xff]  ;;  %v2059_v22 = vld [vmem:[#allocation3 + $0x148] sm:$0xff]  ;;  %v2061_v23 = vld [vmem:[#allocation3 + $0x158] sm:$0xff] }
  0x18   :  { %104 = vmatprep.subr.mxu0 %v2035_v14  ;;  %175 = vmatprep.subr.mxu1 %v2037_v15  ;;  %v2065_v24 = vld [vmem:[#allocation3 + $0x140] sm:$0xff]  ;;  %v2067_v25 = vld [vmem:[#allocation3 + $0x150] sm:$0xff]  ;;  %v2071_v26 = vld [vmem:[#allocation3 + $0x128] sm:$0xff] }
  0x19   :  { %105 = vmatpush1.msra.mxu0 %v2041_v16  ;;  %176 = vmatpush1.msra.mxu1 %v2043_v17  ;;  %v2073_v27 = vld [vmem:[#allocation3 + $0x138] sm:$0xff]  ;;  %v2077_v28 = vld [vmem:[#allocation3 + $0x120] sm:$0xff]  ;;  %v2079_v29 = vld [vmem:[#allocation3 + $0x130] sm:$0xff] }
  0x1a   :  { %106 = vmatprep.subr.mxu0 %v2047_v18  ;;  %177 = vmatprep.subr.mxu1 %v2049_v19  ;;  %v2083_v30 = vld [vmem:[#allocation3 + $0x108] sm:$0xff]  ;;  %v2085_v31 = vld [vmem:[#allocation3 + $0x118] sm:$0xff]  ;;  %v2089_v32 = vld [vmem:[#allocation3 + $0x100] sm:$0xff] }
  0x1b   :  { %107 = vmatpush1.msra.mxu0 %v2053_v20  ;;  %178 = vmatpush1.msra.mxu1 %v2055_v21  ;;  %v2091_v33 = vld [vmem:[#allocation3 + $0x110] sm:$0xff]  ;;  %v2095_v34 = vld [vmem:[#allocation3 + $0xe8] sm:$0xff]  ;;  %v2097_v35 = vld [vmem:[#allocation3 + $0xf8] sm:$0xff] }
  0x1c   :  { %108 = vmatprep.subr.mxu0 %v2059_v22  ;;  %179 = vmatprep.subr.mxu1 %v2061_v23  ;;  %v2101_v36 = vld [vmem:[#allocation3 + $0xe0] sm:$0xff]  ;;  %v2103_v37 = vld [vmem:[#allocation3 + $0xf0] sm:$0xff]  ;;  %v2107_v38 = vld [vmem:[#allocation3 + $0xc8] sm:$0xff] }
  0x1d   :  { %109 = vmatpush1.msra.mxu0 %v2065_v24  ;;  %180 = vmatpush1.msra.mxu1 %v2067_v25  ;;  %v2109_v39 = vld [vmem:[#allocation3 + $0xd8] sm:$0xff]  ;;  %v2113_v40 = vld [vmem:[#allocation3 + $0xc0] sm:$0xff]  ;;  %v2115_v41 = vld [vmem:[#allocation3 + $0xd0] sm:$0xff] }
  0x1e   :  { %110 = vmatprep.subr.mxu0 %v2071_v26  ;;  %181 = vmatprep.subr.mxu1 %v2073_v27  ;;  %v2119_v42 = vld [vmem:[#allocation3 + $0xa8] sm:$0xff]  ;;  %v2121_v43 = vld [vmem:[#allocation3 + $0xb8] sm:$0xff]  ;;  %v2125_v44 = vld [vmem:[#allocation3 + $0xa0] sm:$0xff] }
  0x1f   :  { %111 = vmatpush1.msra.mxu0 %v2077_v28  ;;  %182 = vmatpush1.msra.mxu1 %v2079_v29  ;;  %v2127_v45 = vld [vmem:[#allocation3 + $0xb0] sm:$0xff]  ;;  %v2131_v46 = vld [vmem:[#allocation3 + $0x88] sm:$0xff]  ;;  %v2133_v47 = vld [vmem:[#allocation3 + $0x98] sm:$0xff] }
  0x20   :  { %112 = vmatprep.subr.mxu0 %v2083_v30  ;;  %183 = vmatprep.subr.mxu1 %v2085_v31  ;;  %3010 = vst [vmem:[#allocation8_spill] sm:$0xff] %v2131_v46  ;;  %v2137_v48 = vld [vmem:[#allocation3 + $0x80] sm:$0xff]  ;;  %v2139_v49 = vld [vmem:[#allocation3 + $0x90] sm:$0xff]  ;;  %v2143_v50 = vld [vmem:[#allocation3 + $0x68] sm:$0xff] }
  0x21   :  { %113 = vmatpush1.msra.mxu0 %v2089_v32  ;;  %184 = vmatpush1.msra.mxu1 %v2091_v33  ;;  %3011 = vst [vmem:[#allocation9_spill] sm:$0xff] %v2139_v49  ;;  %3012 = vst [vmem:[#allocation10_spill] sm:$0xff] %v2143_v50  ;;  %v2145_v51 = vld [vmem:[#allocation3 + $0x78] sm:$0xff]  ;;  %v2149_v52 = vld [vmem:[#allocation3 + $0x60] sm:$0xff] }
  0x22   :  { %114 = vmatprep.subr.mxu0 %v2095_v34  ;;  %185 = vmatprep.subr.mxu1 %v2097_v35  ;;  %3013 = vst [vmem:[#allocation11_spill] sm:$0xff] %v2145_v51  ;;  %3014 = vst [vmem:[#allocation12_spill] sm:$0xff] %v2149_v52  ;;  %v2151_v53 = vld [vmem:[#allocation3 + $0x70] sm:$0xff]  ;;  %v2155_v54 = vld [vmem:[#allocation3 + $0x48] sm:$0xff] }
  0x23   :  { %115 = vmatpush1.msra.mxu0 %v2101_v36  ;;  %186 = vmatpush1.msra.mxu1 %v2103_v37  ;;  %3015 = vst [vmem:[#allocation13_spill] sm:$0xff] %v2151_v53  ;;  %3016 = vst [vmem:[#allocation14_spill] sm:$0xff] %v2155_v54  ;;  %v2157_v55 = vld [vmem:[#allocation3 + $0x58] sm:$0xff]  ;;  %v2161_v56 = vld [vmem:[#allocation3 + $0x40] sm:$0xff] }
  0x24   :  { %116 = vmatprep.subr.mxu0 %v2107_v38  ;;  %187 = vmatprep.subr.mxu1 %v2109_v39  ;;  %3017 = vst [vmem:[#allocation15_spill] sm:$0xff] %v2157_v55  ;;  %3018 = vst [vmem:[#allocation16_spill] sm:$0xff] %v2161_v56  ;;  %v2163_v57 = vld [vmem:[#allocation3 + $0x50] sm:$0xff]  ;;  %v2167_v58 = vld [vmem:[#allocation3 + $0x28] sm:$0xff] }
  0x25   :  { %117 = vmatpush1.msra.mxu0 %v2113_v40  ;;  %188 = vmatpush1.msra.mxu1 %v2115_v41  ;;  %3019 = vst [vmem:[#allocation17_spill] sm:$0xff] %v2163_v57  ;;  %3020 = vst [vmem:[#allocation18_spill] sm:$0xff] %v2167_v58  ;;  %v2169_v59 = vld [vmem:[#allocation3 + $0x38] sm:$0xff]  ;;  %v2173_v60 = vld [vmem:[#allocation3 + $0x20] sm:$0xff] }
  0x26   :  { %118 = vmatprep.subr.mxu0 %v2119_v42  ;;  %189 = vmatprep.subr.mxu1 %v2121_v43  ;;  %3021 = vst [vmem:[#allocation19_spill] sm:$0xff] %v2169_v59  ;;  %3022 = vst [vmem:[#allocation20_spill] sm:$0xff] %v2173_v60  ;;  %v2175_v61 = vld [vmem:[#allocation3 + $0x30] sm:$0xff]  ;;  %v2179_v62 = vld [vmem:[#allocation3 + $0x8] sm:$0xff] }
  0x27   :  { %119 = vmatpush1.msra.mxu0 %v2125_v44  ;;  %190 = vmatpush1.msra.mxu1 %v2127_v45  ;;  %3023 = vst [vmem:[#allocation21_spill] sm:$0xff] %v2175_v61  ;;  %3024 = vst [vmem:[#allocation22_spill] sm:$0xff] %v2179_v62  ;;  %v2181_v63 = vld [vmem:[#allocation3 + $0x18] sm:$0xff]  ;;  %v2185_v0 = vld [vmem:[#allocation3] sm:$0xff] }
  0x28   :  { %120 = vmatprep.subr.mxu0 %v2131_v46  ;;  %191 = vmatprep.subr.mxu1 %v2133_v47  ;;  %3025 = vst [vmem:[#allocation23_spill] sm:$0xff] %v2181_v63  ;;  %3026 = vst [vmem:[#allocation24_spill] sm:$0xff] %v2185_v0  ;;  %v2187_v1 = vld [vmem:[#allocation3 + $0x10] sm:$0xff] }
  0x29   :  { %121 = vmatpush1.msra.mxu0 %v2137_v48  ;;  %192 = vmatpush1.msra.mxu1 %v2139_v49  ;;  %3027 = vst [vmem:[#allocation25_spill] sm:$0xff] %v2187_v1 }
  0x2a   :  { %122 = vmatprep.subr.mxu0 %v2143_v50  ;;  %193 = vmatprep.subr.mxu1 %v2145_v51 }
  0x2b   :  { %123 = vmatpush1.msra.mxu0 %v2149_v52  ;;  %194 = vmatpush1.msra.mxu1 %v2151_v53 }
  0x2c   :  { %124 = vmatprep.subr.mxu0 %v2155_v54  ;;  %195 = vmatprep.subr.mxu1 %v2157_v55 }
  0x2d   :  { %125 = vmatpush1.msra.mxu0 %v2161_v56  ;;  %196 = vmatpush1.msra.mxu1 %v2163_v57  ;;  %v3028_v57 = vmov 0.0  }
  0x2e   :  { %126 = vmatprep.subr.mxu0 %v2167_v58  ;;  %197 = vmatprep.subr.mxu1 %v2169_v59 }
  0x2f   :  { %127 = vmatpush1.msra.mxu0 %v2173_v60  ;;  %198 = vmatpush1.msra.mxu1 %v2175_v61 }
  0x30   :  { %128 = vmatprep.subr.mxu0 %v2179_v62  ;;  %199 = vmatprep.subr.mxu1 %v2181_v63 }
  0x31   :  { %129 = vmatpush1.msra.mxu0 %v2185_v0  ;;  %200 = vmatpush1.msra.mxu1 %v2187_v1 }
  0x32   :  { %163 = vmatmul.mubr.f32.vlgmr.msra.gmra.mxu0 %v3028_v57  ;;  %234 = vmatmul.mubr.f32.vlgmr.msra.gmra.mxu1 %v3028_v57 }
  0x33   :  { %290 = vmatprep.subr.mxu0 %v2003_v2  ;;  %361 = vmatprep.subr.mxu1 %v2005_v3 }
  0x34   :  { %291 = vmatpush1.msra.mxu0 %v2007_v4  ;;  %362 = vmatpush1.msra.mxu1 %v2011_v5 }
  0x35   :  { %292 = vmatprep.subr.mxu0 %v2013_v6  ;;  %363 = vmatprep.subr.mxu1 %v2015_v7 }
  0x36   :  { %293 = vmatpush1.msra.mxu0 %v2019_v8  ;;  %364 = vmatpush1.msra.mxu1 %v2021_v9 }
  0x37   :  { %294 = vmatprep.subr.mxu0 %v2023_v10  ;;  %365 = vmatprep.subr.mxu1 %v2027_v11 }
  0x38   :  { %295 = vmatpush1.msra.mxu0 %v2029_v12  ;;  %366 = vmatpush1.msra.mxu1 %v2031_v13 }
  0x39   :  { %296 = vmatprep.subr.mxu0 %v2035_v14  ;;  %367 = vmatprep.subr.mxu1 %v2037_v15 }
  0x3a   :  { %297 = vmatpush1.msra.mxu0 %v2041_v16  ;;  %368 = vmatpush1.msra.mxu1 %v2043_v17 }
  0x3b   :  { %298 = vmatprep.subr.mxu0 %v2047_v18  ;;  %369 = vmatprep.subr.mxu1 %v2049_v19 }
  0x3c   :  { %299 = vmatpush1.msra.mxu0 %v2053_v20  ;;  %370 = vmatpush1.msra.mxu1 %v2055_v21 }
  0x3d   :  { %300 = vmatprep.subr.mxu0 %v2059_v22  ;;  %371 = vmatprep.subr.mxu1 %v2061_v23 }
  0x3e   :  { %301 = vmatpush1.msra.mxu0 %v2065_v24  ;;  %372 = vmatpush1.msra.mxu1 %v2067_v25 }
  0x3f   :  { %302 = vmatprep.subr.mxu0 %v2071_v26  ;;  %373 = vmatprep.subr.mxu1 %v2073_v27 }
  0x40   :  { %303 = vmatpush1.msra.mxu0 %v2077_v28  ;;  %374 = vmatpush1.msra.mxu1 %v2079_v29 }
  0x41   :  { %304 = vmatprep.subr.mxu0 %v2083_v30  ;;  %375 = vmatprep.subr.mxu1 %v2085_v31 }
  0x42   :  { %305 = vmatpush1.msra.mxu0 %v2089_v32  ;;  %376 = vmatpush1.msra.mxu1 %v2091_v33 }
  0x43   :  { %306 = vmatprep.subr.mxu0 %v2095_v34  ;;  %377 = vmatprep.subr.mxu1 %v2097_v35 }
  0x44   :  { %307 = vmatpush1.msra.mxu0 %v2101_v36  ;;  %378 = vmatpush1.msra.mxu1 %v2103_v37 }
  0x45   :  { %308 = vmatprep.subr.mxu0 %v2107_v38  ;;  %379 = vmatprep.subr.mxu1 %v2109_v39 }
  0x46   :  { %309 = vmatpush1.msra.mxu0 %v2113_v40  ;;  %380 = vmatpush1.msra.mxu1 %v2115_v41 }
  0x47   :  { %310 = vmatprep.subr.mxu0 %v2119_v42  ;;  %381 = vmatprep.subr.mxu1 %v2121_v43 }
  0x48   :  { %311 = vmatpush1.msra.mxu0 %v2125_v44  ;;  %382 = vmatpush1.msra.mxu1 %v2127_v45 }
  0x49   :  { %312 = vmatprep.subr.mxu0 %v2131_v46  ;;  %383 = vmatprep.subr.mxu1 %v2133_v47  ;;  %v3029_v46 = vld [vmem:[#allocation17_spill] sm:$0xff] }
  0x4a   :  { %313 = vmatpush1.msra.mxu0 %v2137_v48  ;;  %384 = vmatpush1.msra.mxu1 %v2139_v49 }
  0x4b   :  { %314 = vmatprep.subr.mxu0 %v2143_v50  ;;  %385 = vmatprep.subr.mxu1 %v2145_v51 }
  0x4c   :  { %315 = vmatpush1.msra.mxu0 %v2149_v52  ;;  %386 = vmatpush1.msra.mxu1 %v2151_v53 }
  0x4d   :  { %316 = vmatprep.subr.mxu0 %v2155_v54  ;;  %387 = vmatprep.subr.mxu1 %v2157_v55 }
  0x4e   :  { %317 = vmatpush1.msra.mxu0 %v2161_v56  ;;  %388 = vmatpush1.msra.mxu1 %v3029_v46 }
  0x4f   :  { %318 = vmatprep.subr.mxu0 %v2167_v58  ;;  %389 = vmatprep.subr.mxu1 %v2169_v59  ;;  %v1968_v59 = vmov 1983009808   ;;  %v249_v58 = vlaneseq }
  0x50   :  { %319 = vmatpush1.msra.mxu0 %v2173_v60  ;;  %390 = vmatpush1.msra.mxu1 %v2175_v61  ;;  %v247_v60 = vunpack.c.l.s4 %v1968_v59 }
  0x51   :  { %320 = vmatprep.subr.mxu0 %v2179_v62  ;;  %391 = vmatprep.subr.mxu1 %v2181_v63  ;;  %v250_v46 = vshrl.u32 %v249_v58, 7 }
  0x52   :  { %321 = vmatpush1.msra.mxu0 %v2185_v0  ;;  %354 = vmatprep.mubr.f32.mxu0 %v3028_v57  ;;  %v248_v61 = vunpack.c.0.s8 %v247_v60 }
  0x53   :  { %392 = vmatpush1.msra.mxu1 %v2187_v1  ;;  %425 = vmatprep.mubr.f32.mxu1 %v3028_v57 }
  0x54   :  { %482 = vmatprep.subr.mxu0 %v2003_v2  ;;  %553 = vmatprep.subr.mxu1 %v2005_v3  ;;  %v2265_v63 = vsub.s32 %v248_v61, %v250_v46  ;;  %v97_v3 = vld [vmem:[%s2925_s0] sm:$0xff] }
  0x56   :  { %3030 = vst [vmem:[#allocation26_spill] sm:$0xff] %v2265_v63 }
  0xf2   :  { %v164_v62 = vpop.f32.mrf.mxu0  ;;  %v235_v56 = vpop.f32.mrf.mxu1 }
  0xf4   :  { %v166_v0 = vpop.f32.mrf.mxu0  ;;  %v237_v55 = vpop.f32.mrf.mxu1 }
  0xf5   :  { %v244_v54 = vcombine.low %v164_v62, %v166_v0  ;;  %v245_v53 = vcombine.low %v235_v56, %v237_v55 }
  0xf7   :  { %v252_v1 = vrot.slane %v244_v54, %v2265_v63  ;;  %v259_v57 = vrot.slane %v245_v53, %v2265_v63 }
  0xf9   :  { %v260_v59 = vcombine.low %v252_v1, %v259_v57 }
  0xfb   :  { %v262_v2 = vadd.f32 %v260_v59, %v97_v3 }
  0xfd   :  { %v263_v60 = vmul.f32 0.5, %v262_v2  ;;  %v268_v58 = vrot.slane %v262_v2, 2  ;;  %v274_v46 = vrot.slane %v262_v2, 4  ;;  %v277_v61 = vrot.slane %v262_v2, 6 }
  0xff   :  { %1798 = vtanh.f32 %v263_v60  ;;  %v270_v52 = vmul.f32 0.5, %v268_v58  ;;  %v279_v62 = vmul.f32 0.5, %v277_v61  ;;  %v3034_v58 = vld [vmem:[#allocation12_spill] sm:$0xff]  ;;  %v3036_v61 = vld [vmem:[#allocation14_spill] sm:$0xff] }
 0x101   :  { %1800 = vtanh.f32 %v270_v52 }
 0x102   :  { %1802 = vtanh.f32 %v274_v46  ;;  %v3035_v46 = vld [vmem:[#allocation13_spill] sm:$0xff] }
 0x103   :  { %1804 = vtanh.f32 %v279_v62  ;;  %v3037_v62 = vld [vmem:[#allocation15_spill] sm:$0xff] }
 0x10c   :  { %v1799_v55 = vpop.eup %1798 }
 0x10d   :  { %v265_v56 = vadd.f32 1.0, %v1799_v55  ;;  %v3038_v55 = vld [vmem:[#allocation16_spill] sm:$0xff] }
 0x10e   :  { %v1801_v54 = vpop.eup %1800 }
 0x10f   :  { %v266_v0 = vmul.f32 0.5, %v265_v56  ;;  %v272_v53 = vadd.f32 1.0, %v1801_v54  ;;  %v1803_v51 = vpop.eup %1802  ;;  %v3039_v56 = vld [vmem:[#allocation17_spill] sm:$0xff]  ;;  %v3040_v54 = vld [vmem:[#allocation18_spill] sm:$0xff] }
 0x110   :  { %v1805_v57 = vpop.eup %1804 }
 0x111   :  { %v273_v63 = vmul.f32 0.5, %v272_v53  ;;  %v284_v1 = vmul.f32 %v1803_v51, %v266_v0  ;;  %v281_v52 = vadd.f32 1.0, %v1805_v57  ;;  %v3032_v51 = vld [vmem:[#allocation10_spill] sm:$0xff]  ;;  %v3041_v0 = vld [vmem:[#allocation19_spill] sm:$0xff]  ;;  %v3042_v53 = vld [vmem:[#allocation20_spill] sm:$0xff] }
 0x112   :  { %v3044_v57 = vld [vmem:[#allocation22_spill] sm:$0xff] }
 0x113   :  { %v283_v50 = vmul.f32 0.0, %v273_v63  ;;  %v282_v59 = vmul.f32 0.5, %v281_v52  ;;  %v3033_v63 = vld [vmem:[#allocation11_spill] sm:$0xff] }
 0x114   :  { %v3045_v52 = vld [vmem:[#allocation23_spill] sm:$0xff] }
 0x115   :  { %v2272_v3 = vadd.f32 %v284_v1, %v283_v50  ;;  %v3031_v50 = vld [vmem:[#allocation8_spill] sm:$0xff]  ;;  %v3043_v1 = vld [vmem:[#allocation21_spill] sm:$0xff] }
 0x117   :  { %1806 = vtanh.f32 %v2272_v3 }
 0x124   :  { %v1807_v60 = vpop.eup %1806 }
 0x125   :  { %v287_v2 = vmul.f32 %v1807_v60, %v282_v59  ;;  %v3046_v59 = vld [vmem:[#allocation24_spill] sm:$0xff]  ;;  %v3047_v60 = vmov 0.0  }
 0x127   :  { %355 = vmatmul.mubr.f32.vlgmr.msra.gmra.mxu0 %v287_v2  ;;  %426 = vmatmul.mubr.f32.vlgmr.msra.gmra.mxu1 %v287_v2  ;;  %v3048_v2 = vld [vmem:[#allocation25_spill] sm:$0xff] }
 0x128   :  { %483 = vmatpush1.msra.mxu0 %v2007_v4  ;;  %554 = vmatpush1.msra.mxu1 %v2011_v5 }
 0x129   :  { %484 = vmatprep.subr.mxu0 %v2013_v6  ;;  %555 = vmatprep.subr.mxu1 %v2015_v7 }
 0x12a   :  { %485 = vmatpush1.msra.mxu0 %v2019_v8  ;;  %556 = vmatpush1.msra.mxu1 %v2021_v9 }
 0x12b   :  { %486 = vmatprep.subr.mxu0 %v2023_v10  ;;  %557 = vmatprep.subr.mxu1 %v2027_v11 }
 0x12c   :  { %487 = vmatpush1.msra.mxu0 %v2029_v12  ;;  %558 = vmatpush1.msra.mxu1 %v2031_v13 }
 0x12d   :  { %488 = vmatprep.subr.mxu0 %v2035_v14  ;;  %559 = vmatprep.subr.mxu1 %v2037_v15 }
 0x12e   :  { %489 = vmatpush1.msra.mxu0 %v2041_v16  ;;  %560 = vmatpush1.msra.mxu1 %v2043_v17 }
 0x12f   :  { %490 = vmatprep.subr.mxu0 %v2047_v18  ;;  %561 = vmatprep.subr.mxu1 %v2049_v19 }
 0x130   :  { %491 = vmatpush1.msra.mxu0 %v2053_v20  ;;  %562 = vmatpush1.msra.mxu1 %v2055_v21 }
 0x131   :  { %492 = vmatprep.subr.mxu0 %v2059_v22  ;;  %563 = vmatprep.subr.mxu1 %v2061_v23 }
 0x132   :  { %493 = vmatpush1.msra.mxu0 %v2065_v24  ;;  %564 = vmatpush1.msra.mxu1 %v2067_v25 }
 0x133   :  { %494 = vmatprep.subr.mxu0 %v2071_v26  ;;  %565 = vmatprep.subr.mxu1 %v2073_v27 }
 0x134   :  { %495 = vmatpush1.msra.mxu0 %v2077_v28  ;;  %566 = vmatpush1.msra.mxu1 %v2079_v29 }
 0x135   :  { %496 = vmatprep.subr.mxu0 %v2083_v30  ;;  %567 = vmatprep.subr.mxu1 %v2085_v31 }
 0x136   :  { %497 = vmatpush1.msra.mxu0 %v2089_v32  ;;  %568 = vmatpush1.msra.mxu1 %v2091_v33 }
 0x137   :  { %498 = vmatprep.subr.mxu0 %v2095_v34  ;;  %569 = vmatprep.subr.mxu1 %v2097_v35 }
 0x138   :  { %499 = vmatpush1.msra.mxu0 %v2101_v36  ;;  %570 = vmatpush1.msra.mxu1 %v2103_v37 }
 0x139   :  { %500 = vmatprep.subr.mxu0 %v2107_v38  ;;  %571 = vmatprep.subr.mxu1 %v2109_v39 }
 0x13a   :  { %501 = vmatpush1.msra.mxu0 %v2113_v40  ;;  %572 = vmatpush1.msra.mxu1 %v2115_v41 }
 0x13b   :  { %502 = vmatprep.subr.mxu0 %v2119_v42  ;;  %573 = vmatprep.subr.mxu1 %v2121_v43 }
 0x13c   :  { %503 = vmatpush1.msra.mxu0 %v2125_v44  ;;  %574 = vmatpush1.msra.mxu1 %v2127_v45 }
 0x13d   :  { %504 = vmatprep.subr.mxu0 %v3031_v50  ;;  %575 = vmatprep.subr.mxu1 %v2133_v47 }
 0x13e   :  { %505 = vmatpush1.msra.mxu0 %v2137_v48  ;;  %576 = vmatpush1.msra.mxu1 %v2139_v49 }
 0x13f   :  { %506 = vmatprep.subr.mxu0 %v3032_v51  ;;  %577 = vmatprep.subr.mxu1 %v3033_v63 }
 0x140   :  { %507 = vmatpush1.msra.mxu0 %v3034_v58  ;;  %578 = vmatpush1.msra.mxu1 %v3035_v46 }
 0x141   :  { %508 = vmatprep.subr.mxu0 %v3036_v61  ;;  %579 = vmatprep.subr.mxu1 %v3037_v62  ;;  %v3051_v61 = vld [vmem:[#allocation26_spill] sm:$0xff] }
 0x142   :  { %509 = vmatpush1.msra.mxu0 %v3038_v55  ;;  %580 = vmatpush1.msra.mxu1 %v3039_v56  ;;  %v3049_v56 = vld [vmem:[#allocation6_spill] sm:$0xff] }
 0x143   :  { %510 = vmatprep.subr.mxu0 %v3040_v54  ;;  %581 = vmatprep.subr.mxu1 %v3041_v0  ;;  %v3050_v54 = vld [vmem:[#allocation7_spill] sm:$0xff] }
 0x144   :  { %511 = vmatpush1.msra.mxu0 %v3042_v53  ;;  %582 = vmatpush1.msra.mxu1 %v3043_v1 }
 0x145   :  { %512 = vmatprep.subr.mxu0 %v3044_v57  ;;  %583 = vmatprep.subr.mxu1 %v3045_v52 }
 0x146   :  { %513 = vmatpush1.msra.mxu0 %v3046_v59  ;;  %546 = vmatprep.mubr.f32.mxu0 %v3047_v60 }
 0x147   :  { %584 = vmatpush1.msra.mxu1 %v3048_v2  ;;  %617 = vmatprep.mubr.f32.mxu1 %v3047_v60  ;;  %v1732_v2 = vld [vmem:[%s2925_s0 + $0x8] sm:$0xff] }
 0x148   :  { %674 = vmatprep.subr.mxu0 %v3049_v56  ;;  %745 = vmatprep.subr.mxu1 %v3050_v54 }
 0x1e7   :  { %v356_v0 = vpop.f32.mrf.mxu0  ;;  %v427_v53 = vpop.f32.mrf.mxu1 }
 0x1e9   :  { %v358_v55 = vpop.f32.mrf.mxu0  ;;  %v429_v1 = vpop.f32.mrf.mxu1 }
 0x1ea   :  { %v436_v62 = vcombine.low %v356_v0, %v358_v55  ;;  %v437_v57 = vcombine.low %v427_v53, %v429_v1 }
 0x1ec   :  { %v444_v52 = vrot.slane %v436_v62, %v3051_v61  ;;  %v451_v59 = vrot.slane %v437_v57, %v3051_v61 }
 0x1ee   :  { %v452_v46 = vcombine.low %v444_v52, %v451_v59 }
 0x1f0   :  { %v454_v60 = vadd.f32 %v1732_v2, %v452_v46  ;;  %v3056_v2 = vld [vmem:[#allocation13_spill] sm:$0xff] }
 0x1f2   :  { %v455_v58 = vmul.f32 0.5, %v454_v60  ;;  %v460_v56 = vrot.slane %v454_v60, 2  ;;  %v466_v63 = vrot.slane %v454_v60, 4  ;;  %v469_v51 = vrot.slane %v454_v60, 6  ;;  %v3055_v60 = vld [vmem:[#allocation12_spill] sm:$0xff] }
 0x1f4   :  { %1808 = vtanh.f32 %v455_v58  ;;  %v462_v54 = vmul.f32 0.5, %v460_v56  ;;  %v471_v55 = vmul.f32 0.5, %v469_v51 }
 0x1f6   :  { %1810 = vtanh.f32 %v462_v54 }
 0x1f7   :  { %1812 = vtanh.f32 %v466_v63 }
 0x1f8   :  { %1814 = vtanh.f32 %v471_v55  ;;  %v3057_v55 = vld [vmem:[#allocation14_spill] sm:$0xff] }
 0x201   :  { %v1809_v0 = vpop.eup %1808 }
 0x202   :  { %v457_v53 = vadd.f32 1.0, %v1809_v0  ;;  %v3058_v0 = vld [vmem:[#allocation15_spill] sm:$0xff] }
 0x203   :  { %v1811_v62 = vpop.eup %1810 }
 0x204   :  { %v458_v1 = vmul.f32 0.5, %v457_v53  ;;  %v464_v57 = vadd.f32 1.0, %v1811_v62  ;;  %v1813_v49 = vpop.eup %1812  ;;  %v3059_v53 = vld [vmem:[#allocation16_spill] sm:$0xff]  ;;  %v3060_v62 = vld [vmem:[#allocation17_spill] sm:$0xff] }
 0x205   :  { %v1815_v58 = vpop.eup %1814 }
 0x206   :  { %v465_v61 = vmul.f32 0.5, %v464_v57  ;;  %v476_v46 = vmul.f32 %v1813_v49, %v458_v1  ;;  %v473_v56 = vadd.f32 1.0, %v1815_v58  ;;  %v3052_v49 = vld [vmem:[#allocation9_spill] sm:$0xff]  ;;  %v3061_v1 = vld [vmem:[#allocation18_spill] sm:$0xff]  ;;  %v3062_v57 = vld [vmem:[#allocation19_spill] sm:$0xff] }
 0x207   :  { %v3065_v58 = vld [vmem:[#allocation22_spill] sm:$0xff] }
 0x208   :  { %v475_v52 = vmul.f32 %v465_v61, %v2272_v3  ;;  %v474_v63 = vmul.f32 0.5, %v473_v56  ;;  %v3053_v3 = vld [vmem:[#allocation10_spill] sm:$0xff]  ;;  %v3054_v61 = vld [vmem:[#allocation11_spill] sm:$0xff] }
 0x209   :  { %v3066_v56 = vld [vmem:[#allocation23_spill] sm:$0xff] }
 0x20a   :  { %v2347_v59 = vadd.f32 %v476_v46, %v475_v52  ;;  %v3063_v52 = vld [vmem:[#allocation20_spill] sm:$0xff]  ;;  %v3064_v46 = vld [vmem:[#allocation21_spill] sm:$0xff] }
 0x20c   :  { %1816 = vtanh.f32 %v2347_v59 }
 0x219   :  { %v1817_v54 = vpop.eup %1816 }
 0x21a   :  { %v479_v51 = vmul.f32 %v1817_v54, %v474_v63  ;;  %v3067_v63 = vld [vmem:[#allocation24_spill] sm:$0xff]  ;;  %v3068_v54 = vmov 0.0  }
 0x21c   :  { %547 = vmatmul.mubr.f32.vlgmr.msra.gmra.mxu0 %v479_v51  ;;  %618 = vmatmul.mubr.f32.vlgmr.msra.gmra.mxu1 %v479_v51  ;;  %v3069_v51 = vld [vmem:[#allocation25_spill] sm:$0xff] }
 0x21d   :  { %675 = vmatpush1.msra.mxu0 %v2007_v4  ;;  %746 = vmatpush1.msra.mxu1 %v2011_v5 }
 0x21e   :  { %676 = vmatprep.subr.mxu0 %v2013_v6  ;;  %747 = vmatprep.subr.mxu1 %v2015_v7 }
 0x21f   :  { %677 = vmatpush1.msra.mxu0 %v2019_v8  ;;  %748 = vmatpush1.msra.mxu1 %v2021_v9 }
 0x220   :  { %678 = vmatprep.subr.mxu0 %v2023_v10  ;;  %749 = vmatprep.subr.mxu1 %v2027_v11 }
 0x221   :  { %679 = vmatpush1.msra.mxu0 %v2029_v12  ;;  %750 = vmatpush1.msra.mxu1 %v2031_v13 }
 0x222   :  { %680 = vmatprep.subr.mxu0 %v2035_v14  ;;  %751 = vmatprep.subr.mxu1 %v2037_v15 }
 0x223   :  { %681 = vmatpush1.msra.mxu0 %v2041_v16  ;;  %752 = vmatpush1.msra.mxu1 %v2043_v17 }
 0x224   :  { %682 = vmatprep.subr.mxu0 %v2047_v18  ;;  %753 = vmatprep.subr.mxu1 %v2049_v19 }
 0x225   :  { %683 = vmatpush1.msra.mxu0 %v2053_v20  ;;  %754 = vmatpush1.msra.mxu1 %v2055_v21 }
 0x226   :  { %684 = vmatprep.subr.mxu0 %v2059_v22  ;;  %755 = vmatprep.subr.mxu1 %v2061_v23 }
 0x227   :  { %685 = vmatpush1.msra.mxu0 %v2065_v24  ;;  %756 = vmatpush1.msra.mxu1 %v2067_v25 }
 0x228   :  { %686 = vmatprep.subr.mxu0 %v2071_v26  ;;  %757 = vmatprep.subr.mxu1 %v2073_v27 }
 0x229   :  { %687 = vmatpush1.msra.mxu0 %v2077_v28  ;;  %758 = vmatpush1.msra.mxu1 %v2079_v29 }
 0x22a   :  { %688 = vmatprep.subr.mxu0 %v2083_v30  ;;  %759 = vmatprep.subr.mxu1 %v2085_v31 }
 0x22b   :  { %689 = vmatpush1.msra.mxu0 %v2089_v32  ;;  %760 = vmatpush1.msra.mxu1 %v2091_v33 }
 0x22c   :  { %690 = vmatprep.subr.mxu0 %v2095_v34  ;;  %761 = vmatprep.subr.mxu1 %v2097_v35 }
 0x22d   :  { %691 = vmatpush1.msra.mxu0 %v2101_v36  ;;  %762 = vmatpush1.msra.mxu1 %v2103_v37 }
 0x22e   :  { %692 = vmatprep.subr.mxu0 %v2107_v38  ;;  %763 = vmatprep.subr.mxu1 %v2109_v39 }
 0x22f   :  { %693 = vmatpush1.msra.mxu0 %v2113_v40  ;;  %764 = vmatpush1.msra.mxu1 %v2115_v41 }
 0x230   :  { %694 = vmatprep.subr.mxu0 %v2119_v42  ;;  %765 = vmatprep.subr.mxu1 %v2121_v43 }
 0x231   :  { %695 = vmatpush1.msra.mxu0 %v2125_v44  ;;  %766 = vmatpush1.msra.mxu1 %v2127_v45 }
 0x232   :  { %696 = vmatprep.subr.mxu0 %v3031_v50  ;;  %767 = vmatprep.subr.mxu1 %v2133_v47 }
 0x233   :  { %697 = vmatpush1.msra.mxu0 %v2137_v48  ;;  %768 = vmatpush1.msra.mxu1 %v3052_v49 }
 0x234   :  { %698 = vmatprep.subr.mxu0 %v3053_v3  ;;  %769 = vmatprep.subr.mxu1 %v3054_v61 }
 0x235   :  { %699 = vmatpush1.msra.mxu0 %v3055_v60  ;;  %770 = vmatpush1.msra.mxu1 %v3056_v2 }
 0x236   :  { %700 = vmatprep.subr.mxu0 %v3057_v55  ;;  %771 = vmatprep.subr.mxu1 %v3058_v0  ;;  %v3072_v55 = vld [vmem:[#allocation26_spill] sm:$0xff] }
 0x237   :  { %701 = vmatpush1.msra.mxu0 %v3059_v53  ;;  %772 = vmatpush1.msra.mxu1 %v3060_v62  ;;  %v3070_v62 = vld [vmem:[#allocation6_spill] sm:$0xff] }
 0x238   :  { %702 = vmatprep.subr.mxu0 %v3061_v1  ;;  %773 = vmatprep.subr.mxu1 %v3062_v57  ;;  %v3071_v1 = vld [vmem:[#allocation7_spill] sm:$0xff] }
 0x239   :  { %703 = vmatpush1.msra.mxu0 %v3063_v52  ;;  %774 = vmatpush1.msra.mxu1 %v3064_v46 }
 0x23a   :  { %704 = vmatprep.subr.mxu0 %v3065_v58  ;;  %775 = vmatprep.subr.mxu1 %v3066_v56 }
 0x23b   :  { %705 = vmatpush1.msra.mxu0 %v3067_v63  ;;  %738 = vmatprep.mubr.f32.mxu0 %v3068_v54 }
 0x23c   :  { %776 = vmatpush1.msra.mxu1 %v3069_v51  ;;  %809 = vmatprep.mubr.f32.mxu1 %v3068_v54  ;;  %v1733_v51 = vld [vmem:[%s2925_s0 + $0x10] sm:$0xff] }
 0x23d   :  { %866 = vmatprep.subr.mxu0 %v3070_v62  ;;  %937 = vmatprep.subr.mxu1 %v3071_v1 }
 0x2dc   :  { %v548_v57 = vpop.f32.mrf.mxu0  ;;  %v619_v52 = vpop.f32.mrf.mxu1 }
 0x2de   :  { %v550_v53 = vpop.f32.mrf.mxu0  ;;  %v621_v46 = vpop.f32.mrf.mxu1 }
 0x2df   :  { %v628_v0 = vcombine.low %v548_v57, %v550_v53  ;;  %v629_v58 = vcombine.low %v619_v52, %v621_v46 }
 0x2e1   :  { %v636_v56 = vrot.slane %v628_v0, %v3072_v55  ;;  %v643_v63 = vrot.slane %v629_v58, %v3072_v55 }
 0x2e3   :  { %v644_v2 = vcombine.low %v636_v56, %v643_v63 }
 0x2e5   :  { %v646_v54 = vadd.f32 %v1733_v51, %v644_v2 }
 0x2e7   :  { %v647_v60 = vmul.f32 0.5, %v646_v54  ;;  %v652_v62 = vrot.slane %v646_v54, 2  ;;  %v658_v61 = vrot.slane %v646_v54, 4  ;;  %v661_v3 = vrot.slane %v646_v54, 6 }
 0x2e9   :  { %1818 = vtanh.f32 %v647_v60  ;;  %v654_v1 = vmul.f32 0.5, %v652_v62  ;;  %v663_v53 = vmul.f32 0.5, %v661_v3 }
 0x2eb   :  { %1820 = vtanh.f32 %v654_v1 }
 0x2ec   :  { %1822 = vtanh.f32 %v658_v61 }
 0x2ed   :  { %1824 = vtanh.f32 %v663_v53 }
 0x2f6   :  { %v1819_v57 = vpop.eup %1818 }
 0x2f7   :  { %v649_v52 = vadd.f32 1.0, %v1819_v57 }
 0x2f8   :  { %v1821_v0 = vpop.eup %1820 }
 0x2f9   :  { %v650_v46 = vmul.f32 0.5, %v649_v52  ;;  %v656_v58 = vadd.f32 1.0, %v1821_v0  ;;  %v1823_v49 = vpop.eup %1822  ;;  %v2504_v0 = vld [vmem:[#allocation3 + $0x1e0] sm:$0xff] }
 0x2fa   :  { %v1825_v60 = vpop.eup %1824 }
 0x2fb   :  { %v657_v55 = vmul.f32 0.5, %v656_v58  ;;  %v668_v2 = vmul.f32 %v1823_v49, %v650_v46  ;;  %v665_v51 = vadd.f32 1.0, %v1825_v60  ;;  %v2507_v46 = vld [vmem:[#allocation3 + $0x1f0] sm:$0xff]  ;;  %v2510_v58 = vld [vmem:[#allocation3 + $0x1c8] sm:$0xff] }
 0x2fc   :  { %v2522_v60 = vld [vmem:[#allocation3 + $0x1a8] sm:$0xff] }
 0x2fd   :  { %v667_v56 = vmul.f32 %v657_v55, %v2347_v59  ;;  %v666_v61 = vmul.f32 0.5, %v665_v51  ;;  %v2525_v51 = vld [vmem:[#allocation3 + $0x1b8] sm:$0xff] }
 0x2ff   :  { %v2422_v63 = vadd.f32 %v668_v2, %v667_v56  ;;  %v2513_v56 = vld [vmem:[#allocation3 + $0x1d8] sm:$0xff]  ;;  %v2516_v2 = vld [vmem:[#allocation3 + $0x1c0] sm:$0xff] }
 0x301   :  { %1826 = vtanh.f32 %v2422_v63 }
 0x30e   :  { %v1827_v54 = vpop.eup %1826 }
 0x30f   :  { %v671_v3 = vmul.f32 %v1827_v54, %v666_v61  ;;  %v2528_v61 = vld [vmem:[#allocation3 + $0x1a0] sm:$0xff]  ;;  %v2531_v54 = vld [vmem:[#allocation3 + $0x1b0] sm:$0xff] }
 0x311   :  { %739 = vmatmul.mubr.f32.vlgmr.msra.gmra.mxu0 %v671_v3  ;;  %810 = vmatmul.mubr.f32.vlgmr.msra.gmra.mxu1 %v671_v3  ;;  %v2534_v3 = vld [vmem:[#allocation3 + $0x188] sm:$0xff] }
 0x312   :  { %867 = vmatpush1.msra.mxu0 %v2007_v4  ;;  %938 = vmatpush1.msra.mxu1 %v2011_v5  ;;  %v3073_v4 = vld [vmem:[#allocation9_spill] sm:$0xff]  ;;  %v3074_v5 = vld [vmem:[#allocation10_spill] sm:$0xff] }
 0x313   :  { %868 = vmatprep.subr.mxu0 %v2013_v6  ;;  %939 = vmatprep.subr.mxu1 %v2015_v7  ;;  %v3075_v6 = vld [vmem:[#allocation11_spill] sm:$0xff]  ;;  %v3076_v7 = vld [vmem:[#allocation12_spill] sm:$0xff] }
 0x314   :  { %869 = vmatpush1.msra.mxu0 %v2019_v8  ;;  %940 = vmatpush1.msra.mxu1 %v2021_v9  ;;  %v3077_v8 = vld [vmem:[#allocation13_spill] sm:$0xff]  ;;  %v3078_v9 = vld [vmem:[#allocation14_spill] sm:$0xff] }
 0x315   :  { %870 = vmatprep.subr.mxu0 %v2023_v10  ;;  %941 = vmatprep.subr.mxu1 %v2027_v11  ;;  %v3079_v10 = vld [vmem:[#allocation15_spill] sm:$0xff]  ;;  %v3080_v11 = vld [vmem:[#allocation16_spill] sm:$0xff] }
 0x316   :  { %871 = vmatpush1.msra.mxu0 %v2029_v12  ;;  %942 = vmatpush1.msra.mxu1 %v2031_v13  ;;  %v3081_v12 = vld [vmem:[#allocation17_spill] sm:$0xff]  ;;  %v3082_v13 = vld [vmem:[#allocation18_spill] sm:$0xff] }
 0x317   :  { %872 = vmatprep.subr.mxu0 %v2035_v14  ;;  %943 = vmatprep.subr.mxu1 %v2037_v15  ;;  %v3083_v14 = vld [vmem:[#allocation19_spill] sm:$0xff]  ;;  %v3084_v15 = vld [vmem:[#allocation20_spill] sm:$0xff] }
 0x318   :  { %873 = vmatpush1.msra.mxu0 %v2041_v16  ;;  %944 = vmatpush1.msra.mxu1 %v2043_v17  ;;  %v3085_v16 = vld [vmem:[#allocation21_spill] sm:$0xff]  ;;  %v3086_v17 = vld [vmem:[#allocation22_spill] sm:$0xff] }
 0x319   :  { %874 = vmatprep.subr.mxu0 %v2047_v18  ;;  %945 = vmatprep.subr.mxu1 %v2049_v19  ;;  %v3087_v18 = vld [vmem:[#allocation23_spill] sm:$0xff]  ;;  %v3088_v19 = vld [vmem:[#allocation24_spill] sm:$0xff] }
 0x31a   :  { %875 = vmatpush1.msra.mxu0 %v2053_v20  ;;  %946 = vmatpush1.msra.mxu1 %v2055_v21  ;;  %v3089_v20 = vmov 0.0   ;;  %v3090_v21 = vld [vmem:[#allocation25_spill] sm:$0xff] }
 0x31b   :  { %876 = vmatprep.subr.mxu0 %v2059_v22  ;;  %947 = vmatprep.subr.mxu1 %v2061_v23  ;;  %v2489_v22 = vld [vmem:[#allocation3 + $0x1e8] sm:$0xff]  ;;  %v2492_v23 = vld [vmem:[#allocation3 + $0x1f8] sm:$0xff] }
 0x31c   :  { %877 = vmatpush1.msra.mxu0 %v2065_v24  ;;  %948 = vmatpush1.msra.mxu1 %v2067_v25  ;;  %3091 = vst [vmem:[#allocation8_spill] sm:$0xff] %v2489_v22  ;;  %3092 = vst [vmem:[#allocation6_spill] sm:$0xff] %v2492_v23 }
 0x31d   :  { %878 = vmatprep.subr.mxu0 %v2071_v26  ;;  %949 = vmatprep.subr.mxu1 %v2073_v27 }
 0x31e   :  { %879 = vmatpush1.msra.mxu0 %v2077_v28  ;;  %950 = vmatpush1.msra.mxu1 %v2079_v29 }
 0x31f   :  { %880 = vmatprep.subr.mxu0 %v2083_v30  ;;  %951 = vmatprep.subr.mxu1 %v2085_v31  ;;  %v3093_v30 = vld [vmem:[#allocation26_spill] sm:$0xff] }
 0x320   :  { %881 = vmatpush1.msra.mxu0 %v2089_v32  ;;  %952 = vmatpush1.msra.mxu1 %v2091_v33  ;;  %v1734_v33 = vld [vmem:[%s2925_s0 + $0x18] sm:$0xff] }
 0x321   :  { %882 = vmatprep.subr.mxu0 %v2095_v34  ;;  %953 = vmatprep.subr.mxu1 %v2097_v35 }
 0x322   :  { %883 = vmatpush1.msra.mxu0 %v2101_v36  ;;  %954 = vmatpush1.msra.mxu1 %v2103_v37 }
 0x323   :  { %884 = vmatprep.subr.mxu0 %v2107_v38  ;;  %955 = vmatprep.subr.mxu1 %v2109_v39 }
 0x324   :  { %885 = vmatpush1.msra.mxu0 %v2113_v40  ;;  %956 = vmatpush1.msra.mxu1 %v2115_v41 }
 0x325   :  { %886 = vmatprep.subr.mxu0 %v2119_v42  ;;  %957 = vmatprep.subr.mxu1 %v2121_v43 }
 0x326   :  { %887 = vmatpush1.msra.mxu0 %v2125_v44  ;;  %958 = vmatpush1.msra.mxu1 %v2127_v45 }
 0x327   :  { %888 = vmatprep.subr.mxu0 %v3031_v50  ;;  %959 = vmatprep.subr.mxu1 %v2133_v47 }
 0x328   :  { %889 = vmatpush1.msra.mxu0 %v2137_v48  ;;  %960 = vmatpush1.msra.mxu1 %v3073_v4  ;;  %v2537_v4 = vld [vmem:[#allocation3 + $0x198] sm:$0xff] }
 0x329   :  { %890 = vmatprep.subr.mxu0 %v3074_v5  ;;  %961 = vmatprep.subr.mxu1 %v3075_v6  ;;  %v2540_v5 = vld [vmem:[#allocation3 + $0x180] sm:$0xff]  ;;  %v2543_v6 = vld [vmem:[#allocation3 + $0x190] sm:$0xff] }
 0x32a   :  { %891 = vmatpush1.msra.mxu0 %v3076_v7  ;;  %962 = vmatpush1.msra.mxu1 %v3077_v8 }
 0x32b   :  { %892 = vmatprep.subr.mxu0 %v3078_v9  ;;  %963 = vmatprep.subr.mxu1 %v3079_v10 }
 0x32c   :  { %893 = vmatpush1.msra.mxu0 %v3080_v11  ;;  %964 = vmatpush1.msra.mxu1 %v3081_v12 }
 0x32d   :  { %894 = vmatprep.subr.mxu0 %v3082_v13  ;;  %965 = vmatprep.subr.mxu1 %v3083_v14 }
 0x32e   :  { %895 = vmatpush1.msra.mxu0 %v3084_v15  ;;  %966 = vmatpush1.msra.mxu1 %v3085_v16 }
 0x32f   :  { %896 = vmatprep.subr.mxu0 %v3086_v17  ;;  %967 = vmatprep.subr.mxu1 %v3087_v18 }
 0x330   :  { %897 = vmatpush1.msra.mxu0 %v3088_v19  ;;  %930 = vmatprep.mubr.f32.mxu0 %v3089_v20 }
 0x331   :  { %968 = vmatpush1.msra.mxu1 %v3090_v21  ;;  %1001 = vmatprep.mubr.f32.mxu1 %v3089_v20 }
 0x332   :  { %1058 = vmatprep.subr.mxu0 %v2489_v22  ;;  %1129 = vmatprep.subr.mxu1 %v2492_v23 }
 0x3d1   :  { %v740_v24 = vpop.f32.mrf.mxu0  ;;  %v811_v25 = vpop.f32.mrf.mxu1 }
 0x3d3   :  { %v742_v26 = vpop.f32.mrf.mxu0  ;;  %v813_v27 = vpop.f32.mrf.mxu1 }
 0x3d4   :  { %v820_v28 = vcombine.low %v740_v24, %v742_v26  ;;  %v821_v29 = vcombine.low %v811_v25, %v813_v27  ;;  %v2546_v24 = vld [vmem:[#allocation3 + $0x168] sm:$0xff]  ;;  %v2549_v25 = vld [vmem:[#allocation3 + $0x178] sm:$0xff]  ;;  %v2552_v26 = vld [vmem:[#allocation3 + $0x160] sm:$0xff] }
 0x3d5   :  { %v2555_v27 = vld [vmem:[#allocation3 + $0x170] sm:$0xff] }
 0x3d6   :  { %v828_v31 = vrot.slane %v820_v28, %v3093_v30  ;;  %v835_v32 = vrot.slane %v821_v29, %v3093_v30  ;;  %v2558_v28 = vld [vmem:[#allocation3 + $0x148] sm:$0xff]  ;;  %v2561_v29 = vld [vmem:[#allocation3 + $0x158] sm:$0xff] }
 0x3d8   :  { %v836_v34 = vcombine.low %v828_v31, %v835_v32  ;;  %v2564_v31 = vld [vmem:[#allocation3 + $0x140] sm:$0xff]  ;;  %v2567_v32 = vld [vmem:[#allocation3 + $0x150] sm:$0xff] }
 0x3da   :  { %v838_v35 = vadd.f32 %v1734_v33, %v836_v34  ;;  %v2570_v33 = vld [vmem:[#allocation3 + $0x128] sm:$0xff]  ;;  %v2573_v34 = vld [vmem:[#allocation3 + $0x138] sm:$0xff] }
 0x3dc   :  { %v839_v36 = vmul.f32 0.5, %v838_v35  ;;  %v844_v37 = vrot.slane %v838_v35, 2  ;;  %v850_v39 = vrot.slane %v838_v35, 4  ;;  %v853_v40 = vrot.slane %v838_v35, 6  ;;  %v2576_v35 = vld [vmem:[#allocation3 + $0x120] sm:$0xff] }
 0x3de   :  { %1828 = vtanh.f32 %v839_v36  ;;  %v846_v38 = vmul.f32 0.5, %v844_v37  ;;  %v855_v41 = vmul.f32 0.5, %v853_v40  ;;  %v2579_v36 = vld [vmem:[#allocation3 + $0x130] sm:$0xff]  ;;  %v2582_v37 = vld [vmem:[#allocation3 + $0x108] sm:$0xff] }
 0x3df   :  { %v2591_v40 = vld [vmem:[#allocation3 + $0x110] sm:$0xff] }
 0x3e0   :  { %1830 = vtanh.f32 %v846_v38  ;;  %v2585_v38 = vld [vmem:[#allocation3 + $0x118] sm:$0xff] }
 0x3e1   :  { %1832 = vtanh.f32 %v850_v39  ;;  %v2588_v39 = vld [vmem:[#allocation3 + $0x100] sm:$0xff] }
 0x3e2   :  { %1834 = vtanh.f32 %v855_v41  ;;  %v2594_v41 = vld [vmem:[#allocation3 + $0xe8] sm:$0xff] }
 0x3eb   :  { %v1829_v42 = vpop.eup %1828 }
 0x3ec   :  { %v841_v43 = vadd.f32 1.0, %v1829_v42  ;;  %v2597_v42 = vld [vmem:[#allocation3 + $0xf8] sm:$0xff] }
 0x3ed   :  { %v1831_v44 = vpop.eup %1830 }
 0x3ee   :  { %v842_v45 = vmul.f32 0.5, %v841_v43  ;;  %v848_v47 = vadd.f32 1.0, %v1831_v44  ;;  %v1833_v50 = vpop.eup %1832  ;;  %v2600_v43 = vld [vmem:[#allocation3 + $0xe0] sm:$0xff]  ;;  %v2603_v44 = vld [vmem:[#allocation3 + $0xf0] sm:$0xff] }
 0x3ef   :  { %v1835_v62 = vpop.eup %1834 }
 0x3f0   :  { %v849_v48 = vmul.f32 0.5, %v848_v47  ;;  %v860_v49 = vmul.f32 %v1833_v50, %v842_v45  ;;  %v857_v1 = vadd.f32 1.0, %v1835_v62  ;;  %v2606_v45 = vld [vmem:[#allocation3 + $0xc8] sm:$0xff]  ;;  %v2609_v47 = vld [vmem:[#allocation3 + $0xd8] sm:$0xff]  ;;  %v2615_v50 = vld [vmem:[#allocation3 + $0xd0] sm:$0xff] }
 0x3f1   :  { %v2624_v62 = vld [vmem:[#allocation3 + $0xa0] sm:$0xff] }
 0x3f2   :  { %v859_v59 = vmul.f32 %v849_v48, %v2422_v63  ;;  %v858_v53 = vmul.f32 0.5, %v857_v1  ;;  %v2519_v63 = vld [vmem:[#allocation3 + $0x1d0] sm:$0xff]  ;;  %v2612_v48 = vld [vmem:[#allocation3 + $0xc0] sm:$0xff]  ;;  %3095 = vst [vmem:[#allocation9_spill] sm:$0xff] %v2624_v62 }
 0x3f3   :  { %v2627_v1 = vld [vmem:[#allocation3 + $0xb0] sm:$0xff] }
 0x3f4   :  { %v2501_v55 = vadd.f32 %v860_v49, %v859_v59  ;;  %v2618_v59 = vld [vmem:[#allocation3 + $0xa8] sm:$0xff]  ;;  %v2621_v49 = vld [vmem:[#allocation3 + $0xb8] sm:$0xff]  ;;  %3096 = vst [vmem:[#allocation10_spill] sm:$0xff] %v2627_v1 }
 0x3f5   :  { %3094 = vst [vmem:[#allocation7_spill] sm:$0xff] %v2621_v49 }
 0x3f6   :  { %1836 = vtanh.f32 %v2501_v55 }
 0x403   :  { %v1837_v57 = vpop.eup %1836 }
 0x404   :  { %v863_v52 = vmul.f32 %v1837_v57, %v858_v53  ;;  %v2630_v53 = vld [vmem:[#allocation3 + $0x88] sm:$0xff]  ;;  %v2633_v57 = vld [vmem:[#allocation3 + $0x98] sm:$0xff] }
 0x406   :  { %931 = vmatmul.mubr.f32.vlgmr.msra.gmra.mxu0 %v863_v52  ;;  %1002 = vmatmul.mubr.f32.vlgmr.msra.gmra.mxu1 %v863_v52  ;;  %v2636_v52 = vld [vmem:[#allocation3 + $0x80] sm:$0xff] }
 0x407   :  { %1059 = vmatpush1.msra.mxu0 %v2504_v0  ;;  %1130 = vmatpush1.msra.mxu1 %v2507_v46 }
 0x408   :  { %1060 = vmatprep.subr.mxu0 %v2510_v58  ;;  %1131 = vmatprep.subr.mxu1 %v2513_v56 }
 0x409   :  { %1061 = vmatpush1.msra.mxu0 %v2516_v2  ;;  %1132 = vmatpush1.msra.mxu1 %v2519_v63 }
 0x40a   :  { %1062 = vmatprep.subr.mxu0 %v2522_v60  ;;  %1133 = vmatprep.subr.mxu1 %v2525_v51 }
 0x40b   :  { %1063 = vmatpush1.msra.mxu0 %v2528_v61  ;;  %1134 = vmatpush1.msra.mxu1 %v2531_v54 }
 0x40c   :  { %1064 = vmatprep.subr.mxu0 %v2534_v3  ;;  %1135 = vmatprep.subr.mxu1 %v2537_v4 }
 0x40d   :  { %1065 = vmatpush1.msra.mxu0 %v2540_v5  ;;  %1136 = vmatpush1.msra.mxu1 %v2543_v6 }
 0x40e   :  { %1066 = vmatprep.subr.mxu0 %v2546_v24  ;;  %1137 = vmatprep.subr.mxu1 %v2549_v25 }
 0x40f   :  { %1067 = vmatpush1.msra.mxu0 %v2552_v26  ;;  %1138 = vmatpush1.msra.mxu1 %v2555_v27 }
 0x410   :  { %1068 = vmatprep.subr.mxu0 %v2558_v28  ;;  %1139 = vmatprep.subr.mxu1 %v2561_v29 }
 0x411   :  { %1069 = vmatpush1.msra.mxu0 %v2564_v31  ;;  %1140 = vmatpush1.msra.mxu1 %v2567_v32 }
 0x412   :  { %1070 = vmatprep.subr.mxu0 %v2570_v33  ;;  %1141 = vmatprep.subr.mxu1 %v2573_v34 }
 0x413   :  { %1071 = vmatpush1.msra.mxu0 %v2576_v35  ;;  %1142 = vmatpush1.msra.mxu1 %v2579_v36 }
 0x414   :  { %1072 = vmatprep.subr.mxu0 %v2582_v37  ;;  %1143 = vmatprep.subr.mxu1 %v2585_v38 }
 0x415   :  { %1073 = vmatpush1.msra.mxu0 %v2588_v39  ;;  %1144 = vmatpush1.msra.mxu1 %v2591_v40 }
 0x416   :  { %1074 = vmatprep.subr.mxu0 %v2594_v41  ;;  %1145 = vmatprep.subr.mxu1 %v2597_v42 }
 0x417   :  { %1075 = vmatpush1.msra.mxu0 %v2600_v43  ;;  %1146 = vmatpush1.msra.mxu1 %v2603_v44 }
 0x418   :  { %1076 = vmatprep.subr.mxu0 %v2606_v45  ;;  %1147 = vmatprep.subr.mxu1 %v2609_v47 }
 0x419   :  { %1077 = vmatpush1.msra.mxu0 %v2612_v48  ;;  %1148 = vmatpush1.msra.mxu1 %v2615_v50 }
 0x41a   :  { %1078 = vmatprep.subr.mxu0 %v2618_v59  ;;  %1149 = vmatprep.subr.mxu1 %v2621_v49  ;;  %v2639_v49 = vld [vmem:[#allocation3 + $0x90] sm:$0xff] }
 0x41b   :  { %1079 = vmatpush1.msra.mxu0 %v2624_v62  ;;  %1150 = vmatpush1.msra.mxu1 %v2627_v1  ;;  %3097 = vst [vmem:[#allocation11_spill] sm:$0xff] %v2639_v49  ;;  %v2642_v62 = vld [vmem:[#allocation3 + $0x68] sm:$0xff]  ;;  %v2645_v1 = vld [vmem:[#allocation3 + $0x78] sm:$0xff] }
 0x41c   :  { %1080 = vmatprep.subr.mxu0 %v2630_v53  ;;  %1151 = vmatprep.subr.mxu1 %v2633_v57  ;;  %3098 = vst [vmem:[#allocation12_spill] sm:$0xff] %v2642_v62  ;;  %3099 = vst [vmem:[#allocation13_spill] sm:$0xff] %v2645_v1 }
 0x41d   :  { %1081 = vmatpush1.msra.mxu0 %v2636_v52  ;;  %1152 = vmatpush1.msra.mxu1 %v2639_v49 }
 0x41e   :  { %1082 = vmatprep.subr.mxu0 %v2642_v62  ;;  %1153 = vmatprep.subr.mxu1 %v2645_v1 }
 0x41f   :  { %1083 = vmatpush1.msra.mxu0 %v3076_v7  ;;  %1154 = vmatpush1.msra.mxu1 %v3077_v8 }
 0x420   :  { %1084 = vmatprep.subr.mxu0 %v3078_v9  ;;  %1155 = vmatprep.subr.mxu1 %v3079_v10 }
 0x421   :  { %1085 = vmatpush1.msra.mxu0 %v3080_v11  ;;  %1156 = vmatpush1.msra.mxu1 %v3081_v12 }
 0x422   :  { %1086 = vmatprep.subr.mxu0 %v3082_v13  ;;  %1157 = vmatprep.subr.mxu1 %v3083_v14 }
 0x423   :  { %1087 = vmatpush1.msra.mxu0 %v3084_v15  ;;  %1158 = vmatpush1.msra.mxu1 %v3085_v16  ;;  %v1735_v15 = vld [vmem:[%s2925_s0 + $0x20] sm:$0xff] }
 0x424   :  { %1088 = vmatprep.subr.mxu0 %v3086_v17  ;;  %1159 = vmatprep.subr.mxu1 %v3087_v18 }
 0x425   :  { %1089 = vmatpush1.msra.mxu0 %v3088_v19  ;;  %1122 = vmatprep.mubr.f32.mxu0 %v3089_v20 }
 0x426   :  { %1160 = vmatpush1.msra.mxu1 %v3090_v21  ;;  %1193 = vmatprep.mubr.f32.mxu1 %v3089_v20 }
 0x427   :  { %1250 = vmatprep.subr.mxu0 %v2489_v22  ;;  %1321 = vmatprep.subr.mxu1 %v2492_v23 }
 0x4c6   :  { %v932_v7 = vpop.f32.mrf.mxu0  ;;  %v1003_v8 = vpop.f32.mrf.mxu1 }
 0x4c8   :  { %v934_v9 = vpop.f32.mrf.mxu0  ;;  %v1005_v10 = vpop.f32.mrf.mxu1 }
 0x4c9   :  { %v1012_v11 = vcombine.low %v932_v7, %v934_v9  ;;  %v1013_v12 = vcombine.low %v1003_v8, %v1005_v10 }
 0x4cb   :  { %v1020_v13 = vrot.slane %v1012_v11, %v3093_v30  ;;  %v1027_v14 = vrot.slane %v1013_v12, %v3093_v30 }
 0x4cd   :  { %v1028_v16 = vcombine.low %v1020_v13, %v1027_v14 }
 0x4cf   :  { %v1030_v17 = vadd.f32 %v1735_v15, %v1028_v16 }
 0x4d1   :  { %v1031_v18 = vmul.f32 0.5, %v1030_v17  ;;  %v1036_v19 = vrot.slane %v1030_v17, 2  ;;  %v1042_v23 = vrot.slane %v1030_v17, 4  ;;  %v1045_v22 = vrot.slane %v1030_v17, 6 }
 0x4d3   :  { %1838 = vtanh.f32 %v1031_v18  ;;  %v1038_v21 = vmul.f32 0.5, %v1036_v19  ;;  %v1047_v7 = vmul.f32 0.5, %v1045_v22  ;;  %v2723_v19 = vld [vmem:[#allocation3 + $0x60] sm:$0xff] }
 0x4d4   :  { %3103 = vst [vmem:[#allocation14_spill] sm:$0xff] %v2723_v19 }
 0x4d5   :  { %1840 = vtanh.f32 %v1038_v21  ;;  %v2726_v21 = vld [vmem:[#allocation3 + $0x70] sm:$0xff] }
 0x4d6   :  { %1842 = vtanh.f32 %v1042_v23  ;;  %3104 = vst [vmem:[#allocation15_spill] sm:$0xff] %v2726_v21 }
 0x4d7   :  { %1844 = vtanh.f32 %v1047_v7  ;;  %v2729_v7 = vld [vmem:[#allocation3 + $0x48] sm:$0xff] }
 0x4d8   :  { %3105 = vst [vmem:[#allocation16_spill] sm:$0xff] %v2729_v7 }
 0x4e0   :  { %v1839_v8 = vpop.eup %1838 }
 0x4e1   :  { %v1033_v9 = vadd.f32 1.0, %v1839_v8  ;;  %v2732_v8 = vld [vmem:[#allocation3 + $0x58] sm:$0xff] }
 0x4e2   :  { %v1841_v10 = vpop.eup %1840  ;;  %3106 = vst [vmem:[#allocation17_spill] sm:$0xff] %v2732_v8 }
 0x4e3   :  { %v1034_v11 = vmul.f32 0.5, %v1033_v9  ;;  %v1040_v12 = vadd.f32 1.0, %v1841_v10  ;;  %v1843_v20 = vpop.eup %1842  ;;  %v2735_v9 = vld [vmem:[#allocation3 + $0x40] sm:$0xff]  ;;  %v2738_v10 = vld [vmem:[#allocation3 + $0x50] sm:$0xff] }
 0x4e4   :  { %v1845_v16 = vpop.eup %1844  ;;  %3107 = vst [vmem:[#allocation18_spill] sm:$0xff] %v2735_v9  ;;  %3108 = vst [vmem:[#allocation19_spill] sm:$0xff] %v2738_v10 }
 0x4e5   :  { %v1041_v30 = vmul.f32 0.5, %v1040_v12  ;;  %v1052_v14 = vmul.f32 %v1843_v20, %v1034_v11  ;;  %v1049_v18 = vadd.f32 1.0, %v1845_v16  ;;  %v3100_v20 = vld [vmem:[#allocation7_spill] sm:$0xff]  ;;  %v2744_v12 = vld [vmem:[#allocation3 + $0x38] sm:$0xff] }
 0x4e6   :  { %v2741_v11 = vld [vmem:[#allocation3 + $0x28] sm:$0xff]  ;;  %3110 = vst [vmem:[#allocation21_spill] sm:$0xff] %v2744_v12 }
 0x4e7   :  { %v1051_v13 = vmul.f32 %v1041_v30, %v2501_v55  ;;  %v1050_v23 = vmul.f32 0.5, %v1049_v18  ;;  %v3101_v30 = vld [vmem:[#allocation9_spill] sm:$0xff]  ;;  %v3102_v55 = vld [vmem:[#allocation10_spill] sm:$0xff]  ;;  %3109 = vst [vmem:[#allocation20_spill] sm:$0xff] %v2741_v11  ;;  %v2753_v16 = vld [vmem:[#allocation3 + $0x8] sm:$0xff] }
 0x4e8   :  { %3113 = vst [vmem:[#allocation24_spill] sm:$0xff] %v2753_v16  ;;  %v2756_v18 = vld [vmem:[#allocation3 + $0x18] sm:$0xff] }
 0x4e9   :  { %v2672_v15 = vadd.f32 %v1052_v14, %v1051_v13  ;;  %v2747_v13 = vld [vmem:[#allocation3 + $0x20] sm:$0xff]  ;;  %v2750_v14 = vld [vmem:[#allocation3 + $0x30] sm:$0xff]  ;;  %3114 = vst [vmem:[#allocation25_spill] sm:$0xff] %v2756_v18 }
 0x4ea   :  { %3111 = vst [vmem:[#allocation22_spill] sm:$0xff] %v2747_v13  ;;  %3112 = vst [vmem:[#allocation23_spill] sm:$0xff] %v2750_v14 }
 0x4eb   :  { %1846 = vtanh.f32 %v2672_v15 }
 0x4f8   :  { %v1847_v17 = vpop.eup %1846 }
 0x4f9   :  { %v1055_v22 = vmul.f32 %v1847_v17, %v1050_v23  ;;  %v2759_v23 = vld [vmem:[#allocation3] sm:$0xff]  ;;  %v3116_v17 = vmov 0.0  }
 0x4fa   :  { %3115 = vst [vmem:[#allocation7_spill] sm:$0xff] %v2759_v23 }
 0x4fb   :  { %1123 = vmatmul.mubr.f32.vlgmr.msra.gmra.mxu0 %v1055_v22  ;;  %1194 = vmatmul.mubr.f32.vlgmr.msra.gmra.mxu1 %v1055_v22  ;;  %v2763_v22 = vld [vmem:[#allocation3 + $0x10] sm:$0xff] }
 0x4fc   :  { %1251 = vmatpush1.msra.mxu0 %v2504_v0  ;;  %1322 = vmatpush1.msra.mxu1 %v2507_v46  ;;  %3117 = vst [vmem:[#allocation9_spill] sm:$0xff] %v2763_v22 }
 0x4fd   :  { %1252 = vmatprep.subr.mxu0 %v2510_v58  ;;  %1323 = vmatprep.subr.mxu1 %v2513_v56 }
 0x4fe   :  { %1253 = vmatpush1.msra.mxu0 %v2516_v2  ;;  %1324 = vmatpush1.msra.mxu1 %v2519_v63 }
 0x4ff   :  { %1254 = vmatprep.subr.mxu0 %v2522_v60  ;;  %1325 = vmatprep.subr.mxu1 %v2525_v51 }
 0x500   :  { %1255 = vmatpush1.msra.mxu0 %v2528_v61  ;;  %1326 = vmatpush1.msra.mxu1 %v2531_v54 }
 0x501   :  { %1256 = vmatprep.subr.mxu0 %v2534_v3  ;;  %1327 = vmatprep.subr.mxu1 %v2537_v4 }
 0x502   :  { %1257 = vmatpush1.msra.mxu0 %v2540_v5  ;;  %1328 = vmatpush1.msra.mxu1 %v2543_v6 }
 0x503   :  { %1258 = vmatprep.subr.mxu0 %v2546_v24  ;;  %1329 = vmatprep.subr.mxu1 %v2549_v25 }
 0x504   :  { %1259 = vmatpush1.msra.mxu0 %v2552_v26  ;;  %1330 = vmatpush1.msra.mxu1 %v2555_v27 }
 0x505   :  { %1260 = vmatprep.subr.mxu0 %v2558_v28  ;;  %1331 = vmatprep.subr.mxu1 %v2561_v29 }
 0x506   :  { %1261 = vmatpush1.msra.mxu0 %v2564_v31  ;;  %1332 = vmatpush1.msra.mxu1 %v2567_v32 }
 0x507   :  { %1262 = vmatprep.subr.mxu0 %v2570_v33  ;;  %1333 = vmatprep.subr.mxu1 %v2573_v34 }
 0x508   :  { %1263 = vmatpush1.msra.mxu0 %v2576_v35  ;;  %1334 = vmatpush1.msra.mxu1 %v2579_v36 }
 0x509   :  { %1264 = vmatprep.subr.mxu0 %v2582_v37  ;;  %1335 = vmatprep.subr.mxu1 %v2585_v38 }
 0x50a   :  { %1265 = vmatpush1.msra.mxu0 %v2588_v39  ;;  %1336 = vmatpush1.msra.mxu1 %v2591_v40 }
 0x50b   :  { %1266 = vmatprep.subr.mxu0 %v2594_v41  ;;  %1337 = vmatprep.subr.mxu1 %v2597_v42 }
 0x50c   :  { %1267 = vmatpush1.msra.mxu0 %v2600_v43  ;;  %1338 = vmatpush1.msra.mxu1 %v2603_v44 }
 0x50d   :  { %1268 = vmatprep.subr.mxu0 %v2606_v45  ;;  %1339 = vmatprep.subr.mxu1 %v2609_v47 }
 0x50e   :  { %1269 = vmatpush1.msra.mxu0 %v2612_v48  ;;  %1340 = vmatpush1.msra.mxu1 %v2615_v50 }
 0x50f   :  { %1270 = vmatprep.subr.mxu0 %v2618_v59  ;;  %1341 = vmatprep.subr.mxu1 %v3100_v20 }
 0x510   :  { %1271 = vmatpush1.msra.mxu0 %v3101_v30  ;;  %1342 = vmatpush1.msra.mxu1 %v3102_v55 }
 0x511   :  { %1272 = vmatprep.subr.mxu0 %v2630_v53  ;;  %1343 = vmatprep.subr.mxu1 %v2633_v57 }
 0x512   :  { %1273 = vmatpush1.msra.mxu0 %v2636_v52  ;;  %1344 = vmatpush1.msra.mxu1 %v2639_v49 }
 0x513   :  { %1274 = vmatprep.subr.mxu0 %v2642_v62  ;;  %1345 = vmatprep.subr.mxu1 %v2645_v1 }
 0x514   :  { %1275 = vmatpush1.msra.mxu0 %v2723_v19  ;;  %1346 = vmatpush1.msra.mxu1 %v2726_v21 }
 0x515   :  { %1276 = vmatprep.subr.mxu0 %v2729_v7  ;;  %1347 = vmatprep.subr.mxu1 %v2732_v8  ;;  %v3120_v8 = vld [vmem:[#allocation26_spill] sm:$0xff] }
 0x516   :  { %1277 = vmatpush1.msra.mxu0 %v2735_v9  ;;  %1348 = vmatpush1.msra.mxu1 %v2738_v10 }
 0x517   :  { %1278 = vmatprep.subr.mxu0 %v2741_v11  ;;  %1349 = vmatprep.subr.mxu1 %v2744_v12 }
 0x518   :  { %1279 = vmatpush1.msra.mxu0 %v2747_v13  ;;  %1350 = vmatpush1.msra.mxu1 %v2750_v14  ;;  %v3118_v14 = vld [vmem:[#allocation8_spill] sm:$0xff]  ;;  %v3119_v13 = vld [vmem:[#allocation6_spill] sm:$0xff] }
 0x519   :  { %1280 = vmatprep.subr.mxu0 %v2753_v16  ;;  %1351 = vmatprep.subr.mxu1 %v2756_v18 }
 0x51a   :  { %1281 = vmatpush1.msra.mxu0 %v2759_v23  ;;  %1314 = vmatprep.mubr.f32.mxu0 %v3116_v17 }
 0x51b   :  { %1352 = vmatpush1.msra.mxu1 %v2763_v22  ;;  %1385 = vmatprep.mubr.f32.mxu1 %v3116_v17  ;;  %v1736_v22 = vld [vmem:[%s2925_s0 + $0x28] sm:$0xff] }
 0x51c   :  { %1442 = vmatprep.subr.mxu0 %v3118_v14  ;;  %1513 = vmatprep.subr.mxu1 %v3119_v13 }
 0x5bb   :  { %v1124_v16 = vpop.f32.mrf.mxu0  ;;  %v1195_v12 = vpop.f32.mrf.mxu1 }
 0x5bd   :  { %v1126_v11 = vpop.f32.mrf.mxu0  ;;  %v1197_v18 = vpop.f32.mrf.mxu1 }
 0x5be   :  { %v1204_v10 = vcombine.low %v1124_v16, %v1126_v11  ;;  %v1205_v9 = vcombine.low %v1195_v12, %v1197_v18 }
 0x5c0   :  { %v1212_v23 = vrot.slane %v1204_v10, %v3120_v8  ;;  %v1219_v7 = vrot.slane %v1205_v9, %v3120_v8 }
 0x5c2   :  { %v1220_v21 = vcombine.low %v1212_v23, %v1219_v7 }
 0x5c4   :  { %v1222_v17 = vadd.f32 %v1736_v22, %v1220_v21 }
 0x5c6   :  { %v1223_v19 = vmul.f32 0.5, %v1222_v17  ;;  %v1228_v14 = vrot.slane %v1222_v17, 2  ;;  %v1234_v1 = vrot.slane %v1222_v17, 4  ;;  %v1237_v62 = vrot.slane %v1222_v17, 6 }
 0x5c8   :  { %1848 = vtanh.f32 %v1223_v19  ;;  %v1230_v13 = vmul.f32 0.5, %v1228_v14  ;;  %v1239_v11 = vmul.f32 0.5, %v1237_v62 }
 0x5ca   :  { %1850 = vtanh.f32 %v1230_v13 }
 0x5cb   :  { %1852 = vtanh.f32 %v1234_v1 }
 0x5cc   :  { %1854 = vtanh.f32 %v1239_v11 }
 0x5d5   :  { %v1849_v12 = vpop.eup %1848 }
 0x5d6   :  { %v1225_v16 = vadd.f32 1.0, %v1849_v12  ;;  %v1647_v12 = vld [vmem:[%s2927_s2 + $0x78] sm:$0xff] }
 0x5d7   :  { %v1851_v10 = vpop.eup %1850 }
 0x5d8   :  { %v1226_v18 = vmul.f32 0.5, %v1225_v16  ;;  %v1232_v9 = vadd.f32 1.0, %v1851_v10  ;;  %v1853_v49 = vpop.eup %1852  ;;  %v1646_v16 = vld [vmem:[%s2927_s2 + $0x70] sm:$0xff]  ;;  %v1645_v10 = vld [vmem:[%s2927_s2 + $0x68] sm:$0xff] }
 0x5d9   :  { %v1855_v19 = vpop.eup %1854 }
 0x5da   :  { %v1233_v8 = vmul.f32 0.5, %v1232_v9  ;;  %v1244_v21 = vmul.f32 %v1853_v49, %v1226_v18  ;;  %v1241_v22 = vadd.f32 1.0, %v1855_v19  ;;  %v1644_v18 = vld [vmem:[%s2927_s2 + $0x60] sm:$0xff]  ;;  %v1643_v9 = vld [vmem:[%s2927_s2 + $0x58] sm:$0xff] }
 0x5db   :  { %v1639_v19 = vld [vmem:[%s2927_s2 + $0x38] sm:$0xff] }
 0x5dc   :  { %v1243_v7 = vmul.f32 %v1233_v8, %v2672_v15  ;;  %v1242_v1 = vmul.f32 0.5, %v1241_v22  ;;  %v1638_v22 = vld [vmem:[%s2927_s2 + $0x30] sm:$0xff] }
 0x5de   :  { %v2775_v23 = vadd.f32 %v1244_v21, %v1243_v7  ;;  %v1642_v7 = vld [vmem:[%s2927_s2 + $0x50] sm:$0xff]  ;;  %v1641_v21 = vld [vmem:[%s2927_s2 + $0x48] sm:$0xff] }
 0x5e0   :  { %1856 = vtanh.f32 %v2775_v23 }
 0x5ed   :  { %v1857_v17 = vpop.eup %1856 }
 0x5ee   :  { %v1247_v62 = vmul.f32 %v1857_v17, %v1242_v1  ;;  %v1637_v1 = vld [vmem:[%s2927_s2 + $0x28] sm:$0xff]  ;;  %v1636_v17 = vld [vmem:[%s2927_s2 + $0x20] sm:$0xff] }
 0x5f0   :  { %1315 = vmatmul.mubr.f32.vlgmr.msra.gmra.mxu0 %v1247_v62  ;;  %1386 = vmatmul.mubr.f32.vlgmr.msra.gmra.mxu1 %v1247_v62  ;;  %v1635_v62 = vld [vmem:[%s2927_s2 + $0x18] sm:$0xff] }
 0x5f1   :  { %1443 = vmatpush1.msra.mxu0 %v2504_v0  ;;  %1514 = vmatpush1.msra.mxu1 %v2507_v46  ;;  %v3121_v0 = vld [vmem:[#allocation11_spill] sm:$0xff]  ;;  %v3122_v46 = vld [vmem:[#allocation12_spill] sm:$0xff] }
 0x5f2   :  { %1444 = vmatprep.subr.mxu0 %v2510_v58  ;;  %1515 = vmatprep.subr.mxu1 %v2513_v56  ;;  %v3123_v58 = vld [vmem:[#allocation13_spill] sm:$0xff]  ;;  %v3124_v56 = vld [vmem:[#allocation14_spill] sm:$0xff] }
 0x5f3   :  { %1445 = vmatpush1.msra.mxu0 %v2516_v2  ;;  %1516 = vmatpush1.msra.mxu1 %v2519_v63  ;;  %v3125_v2 = vld [vmem:[#allocation15_spill] sm:$0xff]  ;;  %v3126_v63 = vld [vmem:[#allocation16_spill] sm:$0xff] }
 0x5f4   :  { %1446 = vmatprep.subr.mxu0 %v2522_v60  ;;  %1517 = vmatprep.subr.mxu1 %v2525_v51  ;;  %v3127_v60 = vld [vmem:[#allocation17_spill] sm:$0xff]  ;;  %v3128_v51 = vld [vmem:[#allocation18_spill] sm:$0xff] }
 0x5f5   :  { %1447 = vmatpush1.msra.mxu0 %v2528_v61  ;;  %1518 = vmatpush1.msra.mxu1 %v2531_v54  ;;  %v3129_v61 = vld [vmem:[#allocation19_spill] sm:$0xff]  ;;  %v3130_v54 = vld [vmem:[#allocation20_spill] sm:$0xff] }
 0x5f6   :  { %1448 = vmatprep.subr.mxu0 %v2534_v3  ;;  %1519 = vmatprep.subr.mxu1 %v2537_v4  ;;  %v3131_v3 = vld [vmem:[#allocation21_spill] sm:$0xff]  ;;  %v3132_v4 = vld [vmem:[#allocation22_spill] sm:$0xff] }
 0x5f7   :  { %1449 = vmatpush1.msra.mxu0 %v2540_v5  ;;  %1520 = vmatpush1.msra.mxu1 %v2543_v6  ;;  %v3133_v5 = vld [vmem:[#allocation23_spill] sm:$0xff]  ;;  %v3134_v6 = vld [vmem:[#allocation24_spill] sm:$0xff] }
 0x5f8   :  { %1450 = vmatprep.subr.mxu0 %v2546_v24  ;;  %1521 = vmatprep.subr.mxu1 %v2549_v25  ;;  %v3135_v24 = vld [vmem:[#allocation25_spill] sm:$0xff]  ;;  %v3136_v25 = vld [vmem:[#allocation7_spill] sm:$0xff] }
 0x5f9   :  { %1451 = vmatpush1.msra.mxu0 %v2552_v26  ;;  %1522 = vmatpush1.msra.mxu1 %v2555_v27  ;;  %v3137_v26 = vmov 0.0   ;;  %v3138_v27 = vld [vmem:[#allocation9_spill] sm:$0xff] }
 0x5fa   :  { %1452 = vmatprep.subr.mxu0 %v2558_v28  ;;  %1523 = vmatprep.subr.mxu1 %v2561_v29 }
 0x5fb   :  { %1453 = vmatpush1.msra.mxu0 %v2564_v31  ;;  %1524 = vmatpush1.msra.mxu1 %v2567_v32 }
 0x5fc   :  { %1454 = vmatprep.subr.mxu0 %v2570_v33  ;;  %1525 = vmatprep.subr.mxu1 %v2573_v34 }
 0x5fd   :  { %1455 = vmatpush1.msra.mxu0 %v2576_v35  ;;  %1526 = vmatpush1.msra.mxu1 %v2579_v36  ;;  %v3139_v35 = vld [vmem:[#allocation26_spill] sm:$0xff] }
 0x5fe   :  { %1456 = vmatprep.subr.mxu0 %v2582_v37  ;;  %1527 = vmatprep.subr.mxu1 %v2585_v38  ;;  %v1737_v38 = vld [vmem:[%s2925_s0 + $0x30] sm:$0xff] }
 0x5ff   :  { %1457 = vmatpush1.msra.mxu0 %v2588_v39  ;;  %1528 = vmatpush1.msra.mxu1 %v2591_v40 }
 0x600   :  { %1458 = vmatprep.subr.mxu0 %v2594_v41  ;;  %1529 = vmatprep.subr.mxu1 %v2597_v42 }
 0x601   :  { %1459 = vmatpush1.msra.mxu0 %v2600_v43  ;;  %1530 = vmatpush1.msra.mxu1 %v2603_v44 }
 0x602   :  { %1460 = vmatprep.subr.mxu0 %v2606_v45  ;;  %1531 = vmatprep.subr.mxu1 %v2609_v47 }
 0x603   :  { %1461 = vmatpush1.msra.mxu0 %v2612_v48  ;;  %1532 = vmatpush1.msra.mxu1 %v2615_v50 }
 0x604   :  { %1462 = vmatprep.subr.mxu0 %v2618_v59  ;;  %1533 = vmatprep.subr.mxu1 %v3100_v20 }
 0x605   :  { %1463 = vmatpush1.msra.mxu0 %v3101_v30  ;;  %1534 = vmatpush1.msra.mxu1 %v3102_v55 }
 0x606   :  { %1464 = vmatprep.subr.mxu0 %v2630_v53  ;;  %1535 = vmatprep.subr.mxu1 %v2633_v57 }
 0x607   :  { %1465 = vmatpush1.msra.mxu0 %v2636_v52  ;;  %1536 = vmatpush1.msra.mxu1 %v3121_v0  ;;  %v1634_v0 = vld [vmem:[%s2927_s2 + $0x10] sm:$0xff] }
 0x608   :  { %1466 = vmatprep.subr.mxu0 %v3122_v46  ;;  %1537 = vmatprep.subr.mxu1 %v3123_v58  ;;  %v1633_v46 = vld [vmem:[%s2927_s2 + $0x8] sm:$0xff]  ;;  %v1632_v58 = vld [vmem:[%s2927_s2] sm:$0xff] }
 0x609   :  { %1467 = vmatpush1.msra.mxu0 %v3124_v56  ;;  %1538 = vmatpush1.msra.mxu1 %v3125_v2 }
 0x60a   :  { %1468 = vmatprep.subr.mxu0 %v3126_v63  ;;  %1539 = vmatprep.subr.mxu1 %v3127_v60 }
 0x60b   :  { %1469 = vmatpush1.msra.mxu0 %v3128_v51  ;;  %1540 = vmatpush1.msra.mxu1 %v3129_v61 }
 0x60c   :  { %1470 = vmatprep.subr.mxu0 %v3130_v54  ;;  %1541 = vmatprep.subr.mxu1 %v3131_v3 }
 0x60d   :  { %1471 = vmatpush1.msra.mxu0 %v3132_v4  ;;  %1542 = vmatpush1.msra.mxu1 %v3133_v5  ;;  %v1738_v4 = vld [vmem:[%s2925_s0 + $0x38] sm:$0xff] }
 0x60e   :  { %1472 = vmatprep.subr.mxu0 %v3134_v6  ;;  %1543 = vmatprep.subr.mxu1 %v3135_v24 }
 0x60f   :  { %1473 = vmatpush1.msra.mxu0 %v3136_v25  ;;  %1506 = vmatprep.mubr.f32.mxu0 %v3137_v26 }
 0x610   :  { %1544 = vmatpush1.msra.mxu1 %v3138_v27  ;;  %1577 = vmatprep.mubr.f32.mxu1 %v3137_v26 }
 0x611   :  { %1757 = vmatprep.subr.mxu0 %v3137_v26 }
 0x6b0   :  { %v1316_v28 = vpop.f32.mrf.mxu0  ;;  %v1387_v29 = vpop.f32.mrf.mxu1 }
 0x6b2   :  { %v1318_v31 = vpop.f32.mrf.mxu0  ;;  %v1389_v32 = vpop.f32.mrf.mxu1 }
 0x6b3   :  { %v1396_v33 = vcombine.low %v1316_v28, %v1318_v31  ;;  %v1397_v34 = vcombine.low %v1387_v29, %v1389_v32 }
 0x6b5   :  { %v1404_v36 = vrot.slane %v1396_v33, %v3139_v35  ;;  %v1411_v37 = vrot.slane %v1397_v34, %v3139_v35 }
 0x6b7   :  { %v1412_v39 = vcombine.low %v1404_v36, %v1411_v37 }
 0x6b9   :  { %v1414_v40 = vadd.f32 %v1737_v38, %v1412_v39 }
 0x6bb   :  { %v1415_v41 = vmul.f32 0.5, %v1414_v40  ;;  %v1420_v42 = vrot.slane %v1414_v40, 2  ;;  %v1426_v44 = vrot.slane %v1414_v40, 4  ;;  %v1429_v45 = vrot.slane %v1414_v40, 6 }
 0x6bd   :  { %1858 = vtanh.f32 %v1415_v41  ;;  %v1422_v43 = vmul.f32 0.5, %v1420_v42  ;;  %v1431_v47 = vmul.f32 0.5, %v1429_v45 }
 0x6bf   :  { %1860 = vtanh.f32 %v1422_v43 }
 0x6c0   :  { %1862 = vtanh.f32 %v1426_v44 }
 0x6c1   :  { %1864 = vtanh.f32 %v1431_v47  ;;  %v1739_v47 = vld [vmem:[#allocation2] ss:$0 sm:$0xff] }
 0x6ca   :  { %v1859_v48 = vpop.eup %1858 }
 0x6cb   :  { %v1417_v50 = vadd.f32 1.0, %v1859_v48 }
 0x6cc   :  { %v1861_v59 = vpop.eup %1860 }
 0x6cd   :  { %v1418_v49 = vmul.f32 0.5, %v1417_v50  ;;  %v1424_v53 = vadd.f32 1.0, %v1861_v59  ;;  %v1863_v52 = vpop.eup %1862 }
 0x6ce   :  { %v1865_v55 = vpop.eup %1864 }
 0x6cf   :  { %v1425_v57 = vmul.f32 0.5, %v1424_v53  ;;  %v1436_v20 = vmul.f32 %v1863_v52, %v1418_v49  ;;  %v1433_v8 = vadd.f32 1.0, %v1865_v55 }
 0x6d1   :  { %v1435_v15 = vmul.f32 %v1425_v57, %v2775_v23  ;;  %v1434_v14 = vmul.f32 0.5, %v1433_v8  ;;  %v1640_v23 = vld [vmem:[%s2927_s2 + $0x40] sm:$0xff] }
 0x6d3   :  { %v2849_v30 = vadd.f32 %v1436_v20, %v1435_v15 }
 0x6d5   :  { %1866 = vtanh.f32 %v2849_v30 }
 0x6e2   :  { %v1867_v13 = vpop.eup %1866 }
 0x6e3   :  { %v1439_v11 = vmul.f32 %v1867_v13, %v1434_v14 }
 0x6e5   :  { %1507 = vmatmul.mubr.f32.vlgmr.msra.gmra.mxu0 %v1439_v11  ;;  %1578 = vmatmul.mubr.f32.vlgmr.msra.gmra.mxu1 %v1439_v11 }
 0x6e6   :  { %1758 = vmatpush3.msra.mxu0 %v1647_v12  ;;  %1789 = vmatprep.mubr.msk.f32.mxu0 %vm1969_vm0, %v3137_v26 }
 0x6e7   :  { %1759 = vmatprep.subr.mxu0 %v3137_v26 }
 0x6e8   :  { %1760 = vmatpush3.msra.mxu0 %v1646_v16 }
 0x6e9   :  { %1761 = vmatprep.subr.mxu0 %v3137_v26 }
 0x6ea   :  { %1762 = vmatpush3.msra.mxu0 %v1645_v10 }
 0x6eb   :  { %1763 = vmatprep.subr.mxu0 %v3137_v26 }
 0x6ec   :  { %1764 = vmatpush3.msra.mxu0 %v1644_v18 }
 0x6ed   :  { %1765 = vmatprep.subr.mxu0 %v3137_v26 }
 0x6ee   :  { %1766 = vmatpush3.msra.mxu0 %v1643_v9 }
 0x6ef   :  { %1767 = vmatprep.subr.mxu0 %v3137_v26 }
 0x6f0   :  { %1768 = vmatpush3.msra.mxu0 %v1642_v7 }
 0x6f1   :  { %1769 = vmatprep.subr.mxu0 %v3137_v26 }
 0x6f2   :  { %1770 = vmatpush3.msra.mxu0 %v1641_v21 }
 0x6f3   :  { %1771 = vmatprep.subr.mxu0 %v3137_v26 }
 0x6f4   :  { %1772 = vmatpush3.msra.mxu0 %v1640_v23 }
 0x6f5   :  { %1773 = vmatprep.subr.mxu0 %v3137_v26 }
 0x6f6   :  { %1774 = vmatpush3.msra.mxu0 %v1639_v19 }
 0x6f7   :  { %1775 = vmatprep.subr.mxu0 %v3137_v26 }
 0x6f8   :  { %1776 = vmatpush3.msra.mxu0 %v1638_v22 }
 0x6f9   :  { %1777 = vmatprep.subr.mxu0 %v3137_v26 }
 0x6fa   :  { %1778 = vmatpush3.msra.mxu0 %v1637_v1 }
 0x6fb   :  { %1779 = vmatprep.subr.mxu0 %v3137_v26 }
 0x6fc   :  { %1780 = vmatpush3.msra.mxu0 %v1636_v17 }
 0x6fd   :  { %1781 = vmatprep.subr.mxu0 %v3137_v26 }
 0x6fe   :  { %1782 = vmatpush3.msra.mxu0 %v1635_v62 }
 0x6ff   :  { %1783 = vmatprep.subr.mxu0 %v3137_v26 }
 0x700   :  { %1784 = vmatpush3.msra.mxu0 %v1634_v0 }
 0x701   :  { %1785 = vmatprep.subr.mxu0 %v3137_v26 }
 0x702   :  { %1786 = vmatpush3.msra.mxu0 %v1633_v46 }
 0x703   :  { %1787 = vmatprep.subr.mxu0 %v3137_v26 }
 0x704   :  { %1788 = vmatpush3.msra.mxu0 %v1632_v58 }
 0x7a5   :  { %v1508_v56 = vpop.f32.mrf.mxu0  ;;  %v1579_v2 = vpop.f32.mrf.mxu1 }
 0x7a7   :  { %v1510_v63 = vpop.f32.mrf.mxu0  ;;  %v1581_v60 = vpop.f32.mrf.mxu1 }
 0x7a8   :  { %v1588_v51 = vcombine.low %v1508_v56, %v1510_v63  ;;  %v1589_v61 = vcombine.low %v1579_v2, %v1581_v60 }
 0x7aa   :  { %v1596_v54 = vrot.slane %v1588_v51, %v3139_v35  ;;  %v1603_v3 = vrot.slane %v1589_v61, %v3139_v35 }
 0x7ac   :  { %v1604_v5 = vcombine.low %v1596_v54, %v1603_v3 }
 0x7ae   :  { %v1606_v6 = vadd.f32 %v1738_v4, %v1604_v5 }
 0x7b0   :  { %v1607_v24 = vmul.f32 0.5, %v1606_v6  ;;  %v1612_v25 = vrot.slane %v1606_v6, 2  ;;  %v1618_v27 = vrot.slane %v1606_v6, 4  ;;  %v1621_v28 = vrot.slane %v1606_v6, 6 }
 0x7b2   :  { %1868 = vtanh.f32 %v1607_v24  ;;  %v1614_v26 = vmul.f32 0.5, %v1612_v25  ;;  %v1623_v29 = vmul.f32 0.5, %v1621_v28 }
 0x7b4   :  { %1870 = vtanh.f32 %v1614_v26 }
 0x7b5   :  { %1872 = vtanh.f32 %v1618_v27 }
 0x7b6   :  { %1874 = vtanh.f32 %v1623_v29 }
 0x7bf   :  { %v1869_v31 = vpop.eup %1868 }
 0x7c0   :  { %v1609_v32 = vadd.f32 1.0, %v1869_v31 }
 0x7c1   :  { %v1871_v33 = vpop.eup %1870 }
 0x7c2   :  { %v1610_v34 = vmul.f32 0.5, %v1609_v32  ;;  %v1616_v35 = vadd.f32 1.0, %v1871_v33  ;;  %v1873_v37 = vpop.eup %1872 }
 0x7c3   :  { %v1875_v41 = vpop.eup %1874 }
 0x7c4   :  { %v1617_v36 = vmul.f32 0.5, %v1616_v35  ;;  %v1628_v39 = vmul.f32 %v1873_v37, %v1610_v34  ;;  %v1625_v42 = vadd.f32 1.0, %v1875_v41 }
 0x7c6   :  { %v1627_v38 = vmul.f32 %v1617_v36, %v2849_v30  ;;  %v1626_v43 = vmul.f32 0.5, %v1625_v42 }
 0x7c8   :  { %v1629_v40 = vadd.f32 %v1628_v39, %v1627_v38 }
 0x7ca   :  { %1876 = vtanh.f32 %v1629_v40 }
 0x7d7   :  { %v1877_v44 = vpop.eup %1876 }
 0x7d8   :  { %v1631_v45 = vmul.f32 %v1877_v44, %v1626_v43 }
 0x7da   :  { %1790 = vmatmul.mubr.f32.vlgmr.msra.gmra.mxu0 %v1631_v45 }
 0x89a   :  { %v1721_v48 = vpop.f32.mrf.mxu0 }
 0x89b   :  { %v1722_v50 = vadd.f32 %v1739_v47, %v1721_v48 }
 0x89c   :  { %v1791_v59 = vpop.f32.mrf.mxu0 }
 0x89d   :  { %1726 = vst.msk [vmem:[%s2929_s4] sm:$0x3] %vm1725_vm1, %v1722_v50 }
 0x89e   :  { %1731 = vsyncpa [#allocation4], 1 }

</bundles_post_ra>
